<compile_context>
chip_gen: v7x
topology: tpu7x:2x2x1
jax: 0.10.0
libtpu: 0.0.40
codegen_flags: <defaults>
</compile_context>

<pallas_src>
import jax
import jax.numpy as jnp
from jax.experimental import pallas as pl
from jax.experimental.pallas import tpu as pltpu

_LANES = 128


# ---------------------------------------------------------------------------
# In-kernel helpers
# ---------------------------------------------------------------------------
def _layernorm(h, gamma, beta, eps=1e-5):
    # one-pass moments (two independent reductions that pipeline); f32 only
    mu = jnp.mean(h, axis=-1, keepdims=True)
    msq = jnp.mean(h * h, axis=-1, keepdims=True)
    var = jnp.maximum(msq - mu * mu, 0.0)
    return (h - mu) * jax.lax.rsqrt(var + eps) * gamma + beta


# ---------------------------------------------------------------------------
# Parameter packing (done once, outside the forward)
# ---------------------------------------------------------------------------
def _pack_weights(named, lane=_LANES):
    """Stack 2-D weights into one lane-padded bf16 slab; 8-aligned row starts."""
    rows, layout, off = [], {}, 0
    for name, w in named:
        k, d = w.shape
        layout[name] = (off, k, d)
        w = jnp.pad(w.astype(jnp.bfloat16), ((0, 0), (0, lane - d)))
        k_pad = ((k + 7) // 8) * 8
        if k_pad > k:
            w = jnp.pad(w, ((0, k_pad - k), (0, 0)))
        rows.append(w)
        off += k_pad
    return jnp.concatenate(rows, axis=0), layout


def _pack_vectors(named, lane=_LANES):
    """One f32 row per bias/gamma/beta vector, lane-padded to 128."""
    rows, layout = [], {}
    for i, (name, v) in enumerate(named):
        v = v.reshape(1, -1).astype(jnp.float32)
        d = v.shape[1]
        layout[name] = (i, d)
        rows.append(jnp.pad(v, ((0, 0), (0, lane - d))))
    return jnp.concatenate(rows, axis=0), layout


def pack_params(params):
    named_w = [
        # GraphConv weights pre-stacked: concat([agg, x], -1) @ [Wrel; Wroot]
        ('c1', jnp.concatenate([params['c1_wrel'], params['c1_wroot']], axis=0)),
        ('c2', jnp.concatenate([params['c2_wrel'], params['c2_wroot']], axis=0)),
        ('m1_w1', params['m1_w1']), ('m1_w2', params['m1_w2']),
        ('m2_w1', params['m2_w1']), ('m2_w2', params['m2_w2']),
        ('m2_w3', params['m2_w3']), ('m2_w4', params['m2_w4']),
    ]
    w_slab, wlay = _pack_weights(named_w)

    named_v = [
        ('c1_b', params['c1_brel']), ('n1_g', params['n1_gamma']), ('n1_b', params['n1_beta']),
        ('c2_b', params['c2_brel']), ('n2_g', params['n2_gamma']), ('n2_b', params['n2_beta']),
        ('m1_b1', params['m1_b1']), ('m1_g1', params['m1_g1']), ('m1_be1', params['m1_be1']),
        ('m1_b2', params['m1_b2']),
        ('m2_b1', params['m2_b1']), ('m2_g1', params['m2_g1']), ('m2_be1', params['m2_be1']),
        ('m2_b2', params['m2_b2']), ('m2_g2', params['m2_g2']), ('m2_be2', params['m2_be2']),
        ('m2_b3', params['m2_b3']), ('m2_g3', params['m2_g3']), ('m2_be3', params['m2_be3']),
        ('m2_b4', params['m2_b4']),
    ]
    v_slab, vlay = _pack_vectors(named_v)
    return {'w_slab': w_slab, 'wlay': wlay, 'v_slab': v_slab, 'vlay': vlay}


# ---------------------------------------------------------------------------
# Single fused forward kernel (everything resident in VMEM)
# ---------------------------------------------------------------------------
def make_fused_kernel(N, G, wlay, vlay):
    def kernel(adj_ref, x_ref, batch_ref, feat_ref, w_ref, v_ref, o_ref):
        def W(name):                               # static slice of bf16 weight slab
            r, k, d = wlay[name]
            return w_ref[r:r + k, 0:d]

        vecs = v_ref[...]                          # (Rv,128) f32 — single load

        def V(name):                               # (1,d) f32 bias/gamma/beta
            r, d = vlay[name]
            return vecs[r:r + 1, 0:d]

        def dot32(a, b):
            return jnp.dot(a, b, preferred_element_type=jnp.float32)

        adj = adj_ref[...]                         # bf16 (N,N): loaded once, both convs
        x = x_ref[...]                             # bf16 (N,in_c)
        feats = feat_ref[...]                      # f32 (G,F)

        # ---- mean-pool operator built in-kernel (no P DMA, no pre-call XLA) --
        gids = jax.lax.broadcasted_iota(jnp.int32, (G, N), 0)
        onehot = jnp.where(batch_ref[...] == gids, 1.0, 0.0)      # (G,N) f32
        pool = onehot.astype(jnp.bfloat16)
        inv_cnt = 1.0 / jnp.maximum(jnp.sum(onehot, axis=1, keepdims=True), 1.0)

        def conv_ln_relu(xin_bf, wname, bname, gname, bename):
            # GraphConv: h = [A@x , x] @ [Wrel; Wroot] + b_rel -> LN -> ReLU
            agg = dot32(adj, xin_bf)                                       # f32
            zin = jnp.concatenate([agg, xin_bf.astype(jnp.float32)], axis=-1)
            h = dot32(zin.astype(jnp.bfloat16), W(wname)) + V(bname)
            return jnp.maximum(_layernorm(h, V(gname), V(bename)), 0.0)   # f32

        def mean_pool(h):                                                  # (G,H) f32
            return dot32(pool, h.astype(jnp.bfloat16)) * inv_cnt

        # ---- conv1 -> norm1 -> relu ----------------------------------------
        h1 = conv_ln_relu(x, 'c1', 'c1_b', 'n1_g', 'n1_b')

        # ---- g = mlp1(cat([mean_pool(h1), features])) ------------------------
        z1 = jnp.concatenate([mean_pool(h1), feats], axis=-1).astype(jnp.bfloat16)
        t = dot32(z1, W('m1_w1')) + V('m1_b1')
        t = jnp.maximum(_layernorm(t, V('m1_g1'), V('m1_be1')), 0.0)
        g = dot32(t.astype(jnp.bfloat16), W('m1_w2')) + V('m1_b2')

        # ---- conv2 -> norm2 -> relu (reuses the resident adj tile) ----------
        h2 = conv_ln_relu(h1.astype(jnp.bfloat16), 'c2', 'c2_b', 'n2_g', 'n2_b')

        # ---- out = mlp2(cat([mean_pool(h2), g, features])) -------------------
        z2 = jnp.concatenate([mean_pool(h2), g, feats], axis=-1).astype(jnp.bfloat16)
        u = dot32(z2, W('m2_w1')) + V('m2_b1')
        u = jnp.maximum(_layernorm(u, V('m2_g1'), V('m2_be1')), 0.0)
        u = dot32(u.astype(jnp.bfloat16), W('m2_w2')) + V('m2_b2')
        u = jnp.maximum(_layernorm(u, V('m2_g2'), V('m2_be2')), 0.0)
        u = dot32(u.astype(jnp.bfloat16), W('m2_w3')) + V('m2_b3')
        u = jnp.maximum(_layernorm(u, V('m2_g3'), V('m2_be3')), 0.0)
        o_ref[...] = dot32(u.astype(jnp.bfloat16), W('m2_w4')) + V('m2_b4')

    return kernel


# ---------------------------------------------------------------------------
# Cost estimate (advisory, helps XLA schedule around the single custom call)
# ---------------------------------------------------------------------------
def _cost_estimate(N, G, in_c, H, F, out_c, w_rows, v_rows):
    mm = lambda m, k, n: 2 * m * k * n
    flops = (mm(N, N, in_c) + mm(N, 2 * in_c, H)          # conv1
             + mm(N, N, H) + mm(N, 2 * H, H)              # conv2
             + 2 * mm(G, N, H)                            # two mean-pools
             + mm(G, H + F, 2 * H) + mm(G, 2 * H, 2 * H)  # mlp1
             + mm(G, 3 * H + F, 2 * H) + mm(G, 2 * H, H)  # mlp2
             + mm(G, H, H // 2) + mm(G, H // 2, out_c))
    transcendentals = 2 * N + 4 * G + G                   # rsqrt per LN row + pool recips
    bytes_accessed = (2 * (N * N + N * in_c + w_rows * _LANES)        # bf16 operands
                      + 4 * (N + G * F + v_rows * _LANES + G * out_c))  # i32/f32
    return pl.CostEstimate(flops=flops, transcendentals=transcendentals,
                           bytes_accessed=bytes_accessed)


# ---------------------------------------------------------------------------
# Parameter init (deterministic, in-script)
# ---------------------------------------------------------------------------
def init_params(key, in_channels, hidden, out_channels, num_features):
    H, F = hidden, num_features

    def dense(k, shape):
        return (jax.random.normal(k, shape, jnp.float32)
                / jnp.sqrt(jnp.float32(shape[0])))

    ks = iter(jax.random.split(key, 16))
    p = {}
    # conv1 (GraphConv in_channels -> H)
    p['c1_wrel'] = dense(next(ks), (in_channels, H))
    p['c1_wroot'] = dense(next(ks), (in_channels, H))
    p['c1_brel'] = jnp.zeros((1, H), jnp.float32)
    p['n1_gamma'] = jnp.ones((1, H), jnp.float32)
    p['n1_beta'] = jnp.zeros((1, H), jnp.float32)
    # mlp1: [H+F, 2H, 2H]
    p['m1_w1'] = dense(next(ks), (H + F, 2 * H))
    p['m1_b1'] = jnp.zeros((1, 2 * H), jnp.float32)
    p['m1_g1'] = jnp.ones((1, 2 * H), jnp.float32)
    p['m1_be1'] = jnp.zeros((1, 2 * H), jnp.float32)
    p['m1_w2'] = dense(next(ks), (2 * H, 2 * H))
    p['m1_b2'] = jnp.zeros((1, 2 * H), jnp.float32)
    # conv2 (GraphConv H -> H)
    p['c2_wrel'] = dense(next(ks), (H, H))
    p['c2_wroot'] = dense(next(ks), (H, H))
    p['c2_brel'] = jnp.zeros((1, H), jnp.float32)
    p['n2_gamma'] = jnp.ones((1, H), jnp.float32)
    p['n2_beta'] = jnp.zeros((1, H), jnp.float32)
    # mlp2: [3H+F, 2H, H, H//2, out]
    dims = [3 * H + F, 2 * H, H, H // 2, out_channels]
    for li in range(4):
        p[f'm2_w{li+1}'] = dense(next(ks), (dims[li], dims[li + 1]))
        p[f'm2_b{li+1}'] = jnp.zeros((1, dims[li + 1]), jnp.float32)
        if li < 3:  # hidden layers get LayerNorm
            p[f'm2_g{li+1}'] = jnp.ones((1, dims[li + 1]), jnp.float32)
            p[f'm2_be{li+1}'] = jnp.zeros((1, dims[li + 1]), jnp.float32)
    return p


# ---------------------------------------------------------------------------
# Forward pass: one fused, gridless pallas_call with 6 operands
# ---------------------------------------------------------------------------
def pu_model_forward(packed, x, adj, features, batch, num_graphs,
                     hidden, out_channels):
    H = hidden
    N, in_c = x.shape
    G = num_graphs
    F = features.shape[1]

    # bf16 in the wrapper so the DMA moves half the bytes (adj is the O(N^2) operand)
    adj_bf = adj.astype(jnp.bfloat16)
    x_bf = x.astype(jnp.bfloat16)
    batch_2d = batch.astype(jnp.int32).reshape(1, N)

    kernel = make_fused_kernel(N, G, packed['wlay'], packed['vlay'])
    args = (adj_bf, x_bf, batch_2d, features, packed['w_slab'], packed['v_slab'])

    return pl.pallas_call(
        kernel,
        out_shape=jax.ShapeDtypeStruct((G, out_channels), jnp.float32),
        in_specs=[pl.BlockSpec(memory_space=pltpu.MemorySpace.VMEM)
                  for _ in args],
        out_specs=pl.BlockSpec(memory_space=pltpu.MemorySpace.VMEM),
        cost_estimate=_cost_estimate(N, G, in_c, H, F, out_channels,
                                     packed['w_slab'].shape[0],
                                     packed['v_slab'].shape[0]),
    )(*args)


# ---------------------------------------------------------------------------
# Pure-JAX reference (same math); mxu_dtype=bf16 mirrors the kernel's MXU casts
# ---------------------------------------------------------------------------
def pu_model_reference(params, x, adj, features, batch, num_graphs,
                       mxu_dtype=jnp.float32):
    def mm(a, b):
        return jnp.dot(a.astype(mxu_dtype), b.astype(mxu_dtype),
                       preferred_element_type=jnp.float32)

    def conv(xin, wr, wo, br, gm, bt):
        h = mm(mm(adj, xin), wr) + mm(xin, wo) + br
        return jnp.maximum(_layernorm(h, gm, bt), 0.0)

    onehot = (batch[None, :] == jnp.arange(num_graphs)[:, None]).astype(jnp.float32)
    P = onehot / jnp.maximum(onehot.sum(1, keepdims=True), 1.0)

    h1 = conv(x, params['c1_wrel'], params['c1_wroot'],
              params['c1_brel'], params['n1_gamma'], params['n1_beta'])
    z1 = jnp.concatenate([mm(P, h1), features], axis=1)
    t = jnp.maximum(_layernorm(mm(z1, params['m1_w1']) + params['m1_b1'],
                               params['m1_g1'], params['m1_be1']), 0.0)
    g = mm(t, params['m1_w2']) + params['m1_b2']
    h2 = conv(h1, params['c2_wrel'], params['c2_wroot'],
              params['c2_brel'], params['n2_gamma'], params['n2_beta'])
    z2 = jnp.concatenate([mm(P, h2), g, features], axis=1)
    u = jnp.maximum(_layernorm(mm(z2, params['m2_w1']) + params['m2_b1'],
                               params['m2_g1'], params['m2_be1']), 0.0)
    u = jnp.maximum(_layernorm(mm(u, params['m2_w2']) + params['m2_b2'],
                               params['m2_g2'], params['m2_be2']), 0.0)
    u = jnp.maximum(_layernorm(mm(u, params['m2_w3']) + params['m2_b3'],
                               params['m2_g3'], params['m2_be3']), 0.0)
    return mm(u, params['m2_w4']) + params['m2_b4']


# ---------------------------------------------------------------------------
if __name__ == "__main__":
    IN_C, HID, OUT_C, NFEAT = 8, 32, 2, 4    # in/hidden/out channels, num_features
    N, G = 32, 2                              # nodes, graphs (batch size)

    key = jax.random.PRNGKey(0)
    k_x, k_m, k_w, k_f, k_p = jax.random.split(key, 5)

    x = jax.random.normal(k_x, (N, IN_C), jnp.float32)
    batch = jnp.repeat(jnp.arange(G, dtype=jnp.int32), N // G)

    # block-diagonal (per-graph) weighted dense adjacency, no self loops
    same_graph = (batch[:, None] == batch[None, :]).astype(jnp.float32)
    mask = (jax.random.uniform(k_m, (N, N)) < 0.3).astype(jnp.float32)
    edge_w = jax.random.uniform(k_w, (N, N), minval=0.1, maxval=1.0)
    adj = same_graph * mask * edge_w * (1.0 - jnp.eye(N, dtype=jnp.float32))

    features = jax.random.normal(k_f, (G, NFEAT), jnp.float32)
    params = init_params(k_p, IN_C, HID, OUT_C, NFEAT)
    packed = pack_params(params)             # built once, reused every forward

    out = jax.block_until_ready(
        pu_model_forward(packed, x, adj, features, batch, G, HID, OUT_C))

    ref_bf16 = jax.block_until_ready(
        pu_model_reference(params, x, adj, features, batch, G,
                           mxu_dtype=jnp.bfloat16))
    ref_f32 = jax.block_until_ready(
        pu_model_reference(params, x, adj, features, batch, G,
                           mxu_dtype=jnp.float32))

    assert out.shape == (G, OUT_C) and out.dtype == jnp.float32
    # tight check vs. a bf16-MXU-matched reference (same rounding as the kernel)
    assert bool(jnp.allclose(out, ref_bf16, atol=5e-3, rtol=5e-3)), \
        f"mismatch vs bf16 ref: max abs err {float(jnp.max(jnp.abs(out - ref_bf16)))}"
    # loose sanity check vs. the full-f32 module semantics
    assert bool(jnp.allclose(out, ref_f32, atol=1e-1, rtol=1e-1)), \
        f"mismatch vs f32 ref: max abs err {float(jnp.max(jnp.abs(out - ref_f32)))}"
    print("KERNEL_OK")
</pallas_src>

<mosaic_0001>
module attributes {stable_mosaic.version = 11 : i64} {
  func.func @kernel(%arg0: memref<32x32xbf16, #tpu.memory_space<vmem>>, %arg1: memref<32x8xbf16, #tpu.memory_space<vmem>>, %arg2: memref<1x32xi32, #tpu.memory_space<vmem>>, %arg3: memref<2x4xf32, #tpu.memory_space<vmem>>, %arg4: memref<400x128xbf16, #tpu.memory_space<vmem>>, %arg5: memref<20x128xf32, #tpu.memory_space<vmem>>, %arg6: memref<2x2xf32, #tpu.memory_space<vmem>>) attributes {dimension_semantics = [], scalar_prefetch = 0 : i64, scratch_operands = 0 : i64, tpu.core_type = #tpu.core_type<tc>} {
    %c0 = arith.constant 0 : index
    %c0_0 = arith.constant 0 : index
    %0 = vector.load %arg5[%c0, %c0_0] : memref<20x128xf32, #tpu.memory_space<vmem>>, vector<20x128xf32>
    %c0_1 = arith.constant 0 : index
    %c0_2 = arith.constant 0 : index
    %1 = vector.load %arg0[%c0_1, %c0_2] : memref<32x32xbf16, #tpu.memory_space<vmem>>, vector<32x32xbf16>
    %c0_3 = arith.constant 0 : index
    %c0_4 = arith.constant 0 : index
    %2 = vector.load %arg1[%c0_3, %c0_4] : memref<32x8xbf16, #tpu.memory_space<vmem>>, vector<32x8xbf16>
    %c0_5 = arith.constant 0 : index
    %c0_6 = arith.constant 0 : index
    %3 = vector.load %arg3[%c0_5, %c0_6] : memref<2x4xf32, #tpu.memory_space<vmem>>, vector<2x4xf32>
    %4 = tpu.iota {dimensions = array<i32: 0>} : vector<2x32xi32>
    %c0_7 = arith.constant 0 : index
    %c0_8 = arith.constant 0 : index
    %5 = vector.load %arg2[%c0_7, %c0_8] : memref<1x32xi32, #tpu.memory_space<vmem>>, vector<1x32xi32>
    %6 = vector.broadcast %5 : vector<1x32xi32> to vector<2x32xi32>
    %7 = arith.cmpi eq, %6, %4 : vector<2x32xi32>
    %cst = arith.constant 1.000000e+00 : f32
    %cst_9 = arith.constant 0.000000e+00 : f32
    %8 = vector.broadcast %cst : f32 to vector<2x32xf32>
    %9 = vector.broadcast %cst_9 : f32 to vector<2x32xf32>
    %10 = arith.select %7, %8, %9 : vector<2x32xi1>, vector<2x32xf32>
    %11 = arith.truncf %10 : vector<2x32xf32> to vector<2x32xbf16>
    %cst_10 = arith.constant dense<0.000000e+00> : vector<2xf32>
    %12 = vector.multi_reduction <add>, %10, %cst_10 [1] : vector<2x32xf32> to vector<2xf32>
    %13 = vector.shape_cast %12 : vector<2xf32> to vector<2x1xf32>
    %cst_11 = arith.constant 1.000000e+00 : f32
    %14 = vector.broadcast %cst_11 : f32 to vector<2x1xf32>
    %15 = arith.maximumf %13, %14 : vector<2x1xf32>
    %cst_12 = arith.constant 1.000000e+00 : f32
    %16 = vector.broadcast %cst_12 : f32 to vector<2x1xf32>
    %17 = arith.divf %16, %15 : vector<2x1xf32>
    %cst_13 = arith.constant dense<0.000000e+00> : vector<32x8xf32>
    %18 = tpu.matmul %1, %2, %cst_13 {dimension_numbers = #tpu.dot_dimension_numbers<[1], [0], [0], [1], [0, 0, 1, 1], [], []>} : vector<32x32xbf16>, vector<32x8xbf16>, vector<32x8xf32> -> vector<32x8xf32>
    %19 = arith.extf %2 : vector<32x8xbf16> to vector<32x8xf32>
    %20 = tpu.concatenate %18, %19 in 1 : vector<32x8xf32>, vector<32x8xf32> -> vector<32x16xf32>
    %21 = arith.truncf %20 : vector<32x16xf32> to vector<32x16xbf16>
    %c0_14 = arith.constant 0 : index
    %c0_15 = arith.constant 0 : index
    %22 = vector.load %arg4[%c0_14, %c0_15] : memref<400x128xbf16, #tpu.memory_space<vmem>>, vector<16x32xbf16>
    %cst_16 = arith.constant dense<0.000000e+00> : vector<32x32xf32>
    %23 = tpu.matmul %21, %22, %cst_16 {dimension_numbers = #tpu.dot_dimension_numbers<[1], [0], [0], [1], [0, 0, 1, 1], [], []>} : vector<32x16xbf16>, vector<16x32xbf16>, vector<32x32xf32> -> vector<32x32xf32>
    %24 = vector.extract_strided_slice %0 {offsets = [0, 0], sizes = [1, 32], strides = [1, 1]} : vector<20x128xf32> to vector<1x32xf32>
    %25 = vector.broadcast %24 : vector<1x32xf32> to vector<32x32xf32>
    %26 = arith.addf %23, %25 : vector<32x32xf32>
    %27 = vector.extract_strided_slice %0 {offsets = [1, 0], sizes = [1, 32], strides = [1, 1]} : vector<20x128xf32> to vector<1x32xf32>
    %28 = vector.extract_strided_slice %0 {offsets = [2, 0], sizes = [1, 32], strides = [1, 1]} : vector<20x128xf32> to vector<1x32xf32>
    %cst_17 = arith.constant dense<0.000000e+00> : vector<32xf32>
    %29 = vector.multi_reduction <add>, %26, %cst_17 [1] : vector<32x32xf32> to vector<32xf32>
    %30 = vector.shape_cast %29 : vector<32xf32> to vector<32x1xf32>
    %cst_18 = arith.constant 3.200000e+01 : f32
    %31 = vector.broadcast %cst_18 : f32 to vector<32x1xf32>
    %32 = arith.divf %30, %31 : vector<32x1xf32>
    %33 = arith.mulf %26, %26 : vector<32x32xf32>
    %cst_19 = arith.constant dense<0.000000e+00> : vector<32xf32>
    %34 = vector.multi_reduction <add>, %33, %cst_19 [1] : vector<32x32xf32> to vector<32xf32>
    %35 = vector.shape_cast %34 : vector<32xf32> to vector<32x1xf32>
    %cst_20 = arith.constant 3.200000e+01 : f32
    %36 = vector.broadcast %cst_20 : f32 to vector<32x1xf32>
    %37 = arith.divf %35, %36 : vector<32x1xf32>
    %38 = arith.mulf %32, %32 : vector<32x1xf32>
    %39 = arith.subf %37, %38 : vector<32x1xf32>
    %cst_21 = arith.constant 0.000000e+00 : f32
    %40 = vector.broadcast %cst_21 : f32 to vector<32x1xf32>
    %41 = arith.maximumf %39, %40 : vector<32x1xf32>
    %42 = vector.broadcast %32 : vector<32x1xf32> to vector<32x32xf32>
    %43 = arith.subf %26, %42 : vector<32x32xf32>
    %cst_22 = arith.constant 9.99999974E-6 : f32
    %44 = vector.broadcast %cst_22 : f32 to vector<32x1xf32>
    %45 = arith.addf %41, %44 : vector<32x1xf32>
    %46 = math.rsqrt %45 : vector<32x1xf32>
    %47 = vector.broadcast %46 : vector<32x1xf32> to vector<32x32xf32>
    %48 = arith.mulf %43, %47 : vector<32x32xf32>
    %49 = vector.broadcast %27 : vector<1x32xf32> to vector<32x32xf32>
    %50 = arith.mulf %48, %49 : vector<32x32xf32>
    %51 = vector.broadcast %28 : vector<1x32xf32> to vector<32x32xf32>
    %52 = arith.addf %50, %51 : vector<32x32xf32>
    %cst_23 = arith.constant 0.000000e+00 : f32
    %53 = vector.broadcast %cst_23 : f32 to vector<32x32xf32>
    %54 = arith.maximumf %52, %53 : vector<32x32xf32>
    %55 = arith.truncf %54 : vector<32x32xf32> to vector<32x32xbf16>
    %cst_24 = arith.constant dense<0.000000e+00> : vector<2x32xf32>
    %56 = tpu.matmul %11, %55, %cst_24 {dimension_numbers = #tpu.dot_dimension_numbers<[1], [0], [0], [1], [0, 0, 1, 1], [], []>} : vector<2x32xbf16>, vector<32x32xbf16>, vector<2x32xf32> -> vector<2x32xf32>
    %57 = vector.broadcast %17 : vector<2x1xf32> to vector<2x32xf32>
    %58 = arith.mulf %56, %57 : vector<2x32xf32>
    %59 = tpu.concatenate %58, %3 in 1 : vector<2x32xf32>, vector<2x4xf32> -> vector<2x36xf32>
    %60 = arith.truncf %59 : vector<2x36xf32> to vector<2x36xbf16>
    %c80 = arith.constant 80 : index
    %c0_25 = arith.constant 0 : index
    %61 = vector.load %arg4[%c80, %c0_25] : memref<400x128xbf16, #tpu.memory_space<vmem>>, vector<36x64xbf16>
    %cst_26 = arith.constant dense<0.000000e+00> : vector<2x64xf32>
    %62 = tpu.matmul %60, %61, %cst_26 {dimension_numbers = #tpu.dot_dimension_numbers<[1], [0], [0], [1], [0, 0, 1, 1], [], []>} : vector<2x36xbf16>, vector<36x64xbf16>, vector<2x64xf32> -> vector<2x64xf32>
    %63 = vector.extract_strided_slice %0 {offsets = [6, 0], sizes = [1, 64], strides = [1, 1]} : vector<20x128xf32> to vector<1x64xf32>
    %64 = vector.broadcast %63 : vector<1x64xf32> to vector<2x64xf32>
    %65 = arith.addf %62, %64 : vector<2x64xf32>
    %66 = vector.extract_strided_slice %0 {offsets = [7, 0], sizes = [1, 64], strides = [1, 1]} : vector<20x128xf32> to vector<1x64xf32>
    %67 = vector.extract_strided_slice %0 {offsets = [8, 0], sizes = [1, 64], strides = [1, 1]} : vector<20x128xf32> to vector<1x64xf32>
    %cst_27 = arith.constant dense<0.000000e+00> : vector<2xf32>
    %68 = vector.multi_reduction <add>, %65, %cst_27 [1] : vector<2x64xf32> to vector<2xf32>
    %69 = vector.shape_cast %68 : vector<2xf32> to vector<2x1xf32>
    %cst_28 = arith.constant 6.400000e+01 : f32
    %70 = vector.broadcast %cst_28 : f32 to vector<2x1xf32>
    %71 = arith.divf %69, %70 : vector<2x1xf32>
    %72 = arith.mulf %65, %65 : vector<2x64xf32>
    %cst_29 = arith.constant dense<0.000000e+00> : vector<2xf32>
    %73 = vector.multi_reduction <add>, %72, %cst_29 [1] : vector<2x64xf32> to vector<2xf32>
    %74 = vector.shape_cast %73 : vector<2xf32> to vector<2x1xf32>
    %cst_30 = arith.constant 6.400000e+01 : f32
    %75 = vector.broadcast %cst_30 : f32 to vector<2x1xf32>
    %76 = arith.divf %74, %75 : vector<2x1xf32>
    %77 = arith.mulf %71, %71 : vector<2x1xf32>
    %78 = arith.subf %76, %77 : vector<2x1xf32>
    %cst_31 = arith.constant 0.000000e+00 : f32
    %79 = vector.broadcast %cst_31 : f32 to vector<2x1xf32>
    %80 = arith.maximumf %78, %79 : vector<2x1xf32>
    %81 = vector.broadcast %71 : vector<2x1xf32> to vector<2x64xf32>
    %82 = arith.subf %65, %81 : vector<2x64xf32>
    %cst_32 = arith.constant 9.99999974E-6 : f32
    %83 = vector.broadcast %cst_32 : f32 to vector<2x1xf32>
    %84 = arith.addf %80, %83 : vector<2x1xf32>
    %85 = math.rsqrt %84 : vector<2x1xf32>
    %86 = vector.broadcast %85 : vector<2x1xf32> to vector<2x64xf32>
    %87 = arith.mulf %82, %86 : vector<2x64xf32>
    %88 = vector.broadcast %66 : vector<1x64xf32> to vector<2x64xf32>
    %89 = arith.mulf %87, %88 : vector<2x64xf32>
    %90 = vector.broadcast %67 : vector<1x64xf32> to vector<2x64xf32>
    %91 = arith.addf %89, %90 : vector<2x64xf32>
    %cst_33 = arith.constant 0.000000e+00 : f32
    %92 = vector.broadcast %cst_33 : f32 to vector<2x64xf32>
    %93 = arith.maximumf %91, %92 : vector<2x64xf32>
    %94 = arith.truncf %93 : vector<2x64xf32> to vector<2x64xbf16>
    %c120 = arith.constant 120 : index
    %c0_34 = arith.constant 0 : index
    %95 = vector.load %arg4[%c120, %c0_34] : memref<400x128xbf16, #tpu.memory_space<vmem>>, vector<64x64xbf16>
    %cst_35 = arith.constant dense<0.000000e+00> : vector<2x64xf32>
    %96 = tpu.matmul %94, %95, %cst_35 {dimension_numbers = #tpu.dot_dimension_numbers<[1], [0], [0], [1], [0, 0, 1, 1], [], []>} : vector<2x64xbf16>, vector<64x64xbf16>, vector<2x64xf32> -> vector<2x64xf32>
    %97 = vector.extract_strided_slice %0 {offsets = [9, 0], sizes = [1, 64], strides = [1, 1]} : vector<20x128xf32> to vector<1x64xf32>
    %98 = vector.broadcast %97 : vector<1x64xf32> to vector<2x64xf32>
    %99 = arith.addf %96, %98 : vector<2x64xf32>
    %100 = arith.truncf %54 : vector<32x32xf32> to vector<32x32xbf16>
    %cst_36 = arith.constant dense<0.000000e+00> : vector<32x32xf32>
    %101 = tpu.matmul %1, %100, %cst_36 {dimension_numbers = #tpu.dot_dimension_numbers<[1], [0], [0], [1], [0, 0, 1, 1], [], []>} : vector<32x32xbf16>, vector<32x32xbf16>, vector<32x32xf32> -> vector<32x32xf32>
    %102 = arith.extf %100 : vector<32x32xbf16> to vector<32x32xf32>
    %103 = tpu.concatenate %101, %102 in 1 : vector<32x32xf32>, vector<32x32xf32> -> vector<32x64xf32>
    %104 = arith.truncf %103 : vector<32x64xf32> to vector<32x64xbf16>
    %c16 = arith.constant 16 : index
    %c0_37 = arith.constant 0 : index
    %105 = vector.load %arg4[%c16, %c0_37] : memref<400x128xbf16, #tpu.memory_space<vmem>>, vector<64x32xbf16>
    %cst_38 = arith.constant dense<0.000000e+00> : vector<32x32xf32>
    %106 = tpu.matmul %104, %105, %cst_38 {dimension_numbers = #tpu.dot_dimension_numbers<[1], [0], [0], [1], [0, 0, 1, 1], [], []>} : vector<32x64xbf16>, vector<64x32xbf16>, vector<32x32xf32> -> vector<32x32xf32>
    %107 = vector.extract_strided_slice %0 {offsets = [3, 0], sizes = [1, 32], strides = [1, 1]} : vector<20x128xf32> to vector<1x32xf32>
    %108 = vector.broadcast %107 : vector<1x32xf32> to vector<32x32xf32>
    %109 = arith.addf %106, %108 : vector<32x32xf32>
    %110 = vector.extract_strided_slice %0 {offsets = [4, 0], sizes = [1, 32], strides = [1, 1]} : vector<20x128xf32> to vector<1x32xf32>
    %111 = vector.extract_strided_slice %0 {offsets = [5, 0], sizes = [1, 32], strides = [1, 1]} : vector<20x128xf32> to vector<1x32xf32>
    %cst_39 = arith.constant dense<0.000000e+00> : vector<32xf32>
    %112 = vector.multi_reduction <add>, %109, %cst_39 [1] : vector<32x32xf32> to vector<32xf32>
    %113 = vector.shape_cast %112 : vector<32xf32> to vector<32x1xf32>
    %cst_40 = arith.constant 3.200000e+01 : f32
    %114 = vector.broadcast %cst_40 : f32 to vector<32x1xf32>
    %115 = arith.divf %113, %114 : vector<32x1xf32>
    %116 = arith.mulf %109, %109 : vector<32x32xf32>
    %cst_41 = arith.constant dense<0.000000e+00> : vector<32xf32>
    %117 = vector.multi_reduction <add>, %116, %cst_41 [1] : vector<32x32xf32> to vector<32xf32>
    %118 = vector.shape_cast %117 : vector<32xf32> to vector<32x1xf32>
    %cst_42 = arith.constant 3.200000e+01 : f32
    %119 = vector.broadcast %cst_42 : f32 to vector<32x1xf32>
    %120 = arith.divf %118, %119 : vector<32x1xf32>
    %121 = arith.mulf %115, %115 : vector<32x1xf32>
    %122 = arith.subf %120, %121 : vector<32x1xf32>
    %cst_43 = arith.constant 0.000000e+00 : f32
    %123 = vector.broadcast %cst_43 : f32 to vector<32x1xf32>
    %124 = arith.maximumf %122, %123 : vector<32x1xf32>
    %125 = vector.broadcast %115 : vector<32x1xf32> to vector<32x32xf32>
    %126 = arith.subf %109, %125 : vector<32x32xf32>
    %cst_44 = arith.constant 9.99999974E-6 : f32
    %127 = vector.broadcast %cst_44 : f32 to vector<32x1xf32>
    %128 = arith.addf %124, %127 : vector<32x1xf32>
    %129 = math.rsqrt %128 : vector<32x1xf32>
    %130 = vector.broadcast %129 : vector<32x1xf32> to vector<32x32xf32>
    %131 = arith.mulf %126, %130 : vector<32x32xf32>
    %132 = vector.broadcast %110 : vector<1x32xf32> to vector<32x32xf32>
    %133 = arith.mulf %131, %132 : vector<32x32xf32>
    %134 = vector.broadcast %111 : vector<1x32xf32> to vector<32x32xf32>
    %135 = arith.addf %133, %134 : vector<32x32xf32>
    %cst_45 = arith.constant 0.000000e+00 : f32
    %136 = vector.broadcast %cst_45 : f32 to vector<32x32xf32>
    %137 = arith.maximumf %135, %136 : vector<32x32xf32>
    %138 = arith.truncf %137 : vector<32x32xf32> to vector<32x32xbf16>
    %cst_46 = arith.constant dense<0.000000e+00> : vector<2x32xf32>
    %139 = tpu.matmul %11, %138, %cst_46 {dimension_numbers = #tpu.dot_dimension_numbers<[1], [0], [0], [1], [0, 0, 1, 1], [], []>} : vector<2x32xbf16>, vector<32x32xbf16>, vector<2x32xf32> -> vector<2x32xf32>
    %140 = vector.broadcast %17 : vector<2x1xf32> to vector<2x32xf32>
    %141 = arith.mulf %139, %140 : vector<2x32xf32>
    %142 = tpu.concatenate %141, %99, %3 in 1 : vector<2x32xf32>, vector<2x64xf32>, vector<2x4xf32> -> vector<2x100xf32>
    %143 = arith.truncf %142 : vector<2x100xf32> to vector<2x100xbf16>
    %c184 = arith.constant 184 : index
    %c0_47 = arith.constant 0 : index
    %144 = vector.load %arg4[%c184, %c0_47] : memref<400x128xbf16, #tpu.memory_space<vmem>>, vector<100x64xbf16>
    %cst_48 = arith.constant dense<0.000000e+00> : vector<2x64xf32>
    %145 = tpu.matmul %143, %144, %cst_48 {dimension_numbers = #tpu.dot_dimension_numbers<[1], [0], [0], [1], [0, 0, 1, 1], [], []>} : vector<2x100xbf16>, vector<100x64xbf16>, vector<2x64xf32> -> vector<2x64xf32>
    %146 = vector.extract_strided_slice %0 {offsets = [10, 0], sizes = [1, 64], strides = [1, 1]} : vector<20x128xf32> to vector<1x64xf32>
    %147 = vector.broadcast %146 : vector<1x64xf32> to vector<2x64xf32>
    %148 = arith.addf %145, %147 : vector<2x64xf32>
    %149 = vector.extract_strided_slice %0 {offsets = [11, 0], sizes = [1, 64], strides = [1, 1]} : vector<20x128xf32> to vector<1x64xf32>
    %150 = vector.extract_strided_slice %0 {offsets = [12, 0], sizes = [1, 64], strides = [1, 1]} : vector<20x128xf32> to vector<1x64xf32>
    %cst_49 = arith.constant dense<0.000000e+00> : vector<2xf32>
    %151 = vector.multi_reduction <add>, %148, %cst_49 [1] : vector<2x64xf32> to vector<2xf32>
    %152 = vector.shape_cast %151 : vector<2xf32> to vector<2x1xf32>
    %cst_50 = arith.constant 6.400000e+01 : f32
    %153 = vector.broadcast %cst_50 : f32 to vector<2x1xf32>
    %154 = arith.divf %152, %153 : vector<2x1xf32>
    %155 = arith.mulf %148, %148 : vector<2x64xf32>
    %cst_51 = arith.constant dense<0.000000e+00> : vector<2xf32>
    %156 = vector.multi_reduction <add>, %155, %cst_51 [1] : vector<2x64xf32> to vector<2xf32>
    %157 = vector.shape_cast %156 : vector<2xf32> to vector<2x1xf32>
    %cst_52 = arith.constant 6.400000e+01 : f32
    %158 = vector.broadcast %cst_52 : f32 to vector<2x1xf32>
    %159 = arith.divf %157, %158 : vector<2x1xf32>
    %160 = arith.mulf %154, %154 : vector<2x1xf32>
    %161 = arith.subf %159, %160 : vector<2x1xf32>
    %cst_53 = arith.constant 0.000000e+00 : f32
    %162 = vector.broadcast %cst_53 : f32 to vector<2x1xf32>
    %163 = arith.maximumf %161, %162 : vector<2x1xf32>
    %164 = vector.broadcast %154 : vector<2x1xf32> to vector<2x64xf32>
    %165 = arith.subf %148, %164 : vector<2x64xf32>
    %cst_54 = arith.constant 9.99999974E-6 : f32
    %166 = vector.broadcast %cst_54 : f32 to vector<2x1xf32>
    %167 = arith.addf %163, %166 : vector<2x1xf32>
    %168 = math.rsqrt %167 : vector<2x1xf32>
    %169 = vector.broadcast %168 : vector<2x1xf32> to vector<2x64xf32>
    %170 = arith.mulf %165, %169 : vector<2x64xf32>
    %171 = vector.broadcast %149 : vector<1x64xf32> to vector<2x64xf32>
    %172 = arith.mulf %170, %171 : vector<2x64xf32>
    %173 = vector.broadcast %150 : vector<1x64xf32> to vector<2x64xf32>
    %174 = arith.addf %172, %173 : vector<2x64xf32>
    %cst_55 = arith.constant 0.000000e+00 : f32
    %175 = vector.broadcast %cst_55 : f32 to vector<2x64xf32>
    %176 = arith.maximumf %174, %175 : vector<2x64xf32>
    %177 = arith.truncf %176 : vector<2x64xf32> to vector<2x64xbf16>
    %c288 = arith.constant 288 : index
    %c0_56 = arith.constant 0 : index
    %178 = vector.load %arg4[%c288, %c0_56] : memref<400x128xbf16, #tpu.memory_space<vmem>>, vector<64x32xbf16>
    %cst_57 = arith.constant dense<0.000000e+00> : vector<2x32xf32>
    %179 = tpu.matmul %177, %178, %cst_57 {dimension_numbers = #tpu.dot_dimension_numbers<[1], [0], [0], [1], [0, 0, 1, 1], [], []>} : vector<2x64xbf16>, vector<64x32xbf16>, vector<2x32xf32> -> vector<2x32xf32>
    %180 = vector.extract_strided_slice %0 {offsets = [13, 0], sizes = [1, 32], strides = [1, 1]} : vector<20x128xf32> to vector<1x32xf32>
    %181 = vector.broadcast %180 : vector<1x32xf32> to vector<2x32xf32>
    %182 = arith.addf %179, %181 : vector<2x32xf32>
    %183 = vector.extract_strided_slice %0 {offsets = [14, 0], sizes = [1, 32], strides = [1, 1]} : vector<20x128xf32> to vector<1x32xf32>
    %184 = vector.extract_strided_slice %0 {offsets = [15, 0], sizes = [1, 32], strides = [1, 1]} : vector<20x128xf32> to vector<1x32xf32>
    %cst_58 = arith.constant dense<0.000000e+00> : vector<2xf32>
    %185 = vector.multi_reduction <add>, %182, %cst_58 [1] : vector<2x32xf32> to vector<2xf32>
    %186 = vector.shape_cast %185 : vector<2xf32> to vector<2x1xf32>
    %cst_59 = arith.constant 3.200000e+01 : f32
    %187 = vector.broadcast %cst_59 : f32 to vector<2x1xf32>
    %188 = arith.divf %186, %187 : vector<2x1xf32>
    %189 = arith.mulf %182, %182 : vector<2x32xf32>
    %cst_60 = arith.constant dense<0.000000e+00> : vector<2xf32>
    %190 = vector.multi_reduction <add>, %189, %cst_60 [1] : vector<2x32xf32> to vector<2xf32>
    %191 = vector.shape_cast %190 : vector<2xf32> to vector<2x1xf32>
    %cst_61 = arith.constant 3.200000e+01 : f32
    %192 = vector.broadcast %cst_61 : f32 to vector<2x1xf32>
    %193 = arith.divf %191, %192 : vector<2x1xf32>
    %194 = arith.mulf %188, %188 : vector<2x1xf32>
    %195 = arith.subf %193, %194 : vector<2x1xf32>
    %cst_62 = arith.constant 0.000000e+00 : f32
    %196 = vector.broadcast %cst_62 : f32 to vector<2x1xf32>
    %197 = arith.maximumf %195, %196 : vector<2x1xf32>
    %198 = vector.broadcast %188 : vector<2x1xf32> to vector<2x32xf32>
    %199 = arith.subf %182, %198 : vector<2x32xf32>
    %cst_63 = arith.constant 9.99999974E-6 : f32
    %200 = vector.broadcast %cst_63 : f32 to vector<2x1xf32>
    %201 = arith.addf %197, %200 : vector<2x1xf32>
    %202 = math.rsqrt %201 : vector<2x1xf32>
    %203 = vector.broadcast %202 : vector<2x1xf32> to vector<2x32xf32>
    %204 = arith.mulf %199, %203 : vector<2x32xf32>
    %205 = vector.broadcast %183 : vector<1x32xf32> to vector<2x32xf32>
    %206 = arith.mulf %204, %205 : vector<2x32xf32>
    %207 = vector.broadcast %184 : vector<1x32xf32> to vector<2x32xf32>
    %208 = arith.addf %206, %207 : vector<2x32xf32>
    %cst_64 = arith.constant 0.000000e+00 : f32
    %209 = vector.broadcast %cst_64 : f32 to vector<2x32xf32>
    %210 = arith.maximumf %208, %209 : vector<2x32xf32>
    %211 = arith.truncf %210 : vector<2x32xf32> to vector<2x32xbf16>
    %c352 = arith.constant 352 : index
    %c0_65 = arith.constant 0 : index
    %212 = vector.load %arg4[%c352, %c0_65] : memref<400x128xbf16, #tpu.memory_space<vmem>>, vector<32x16xbf16>
    %cst_66 = arith.constant dense<0.000000e+00> : vector<2x16xf32>
    %213 = tpu.matmul %211, %212, %cst_66 {dimension_numbers = #tpu.dot_dimension_numbers<[1], [0], [0], [1], [0, 0, 1, 1], [], []>} : vector<2x32xbf16>, vector<32x16xbf16>, vector<2x16xf32> -> vector<2x16xf32>
    %214 = vector.extract_strided_slice %0 {offsets = [16, 0], sizes = [1, 16], strides = [1, 1]} : vector<20x128xf32> to vector<1x16xf32>
    %215 = vector.broadcast %214 : vector<1x16xf32> to vector<2x16xf32>
    %216 = arith.addf %213, %215 : vector<2x16xf32>
    %217 = vector.extract_strided_slice %0 {offsets = [17, 0], sizes = [1, 16], strides = [1, 1]} : vector<20x128xf32> to vector<1x16xf32>
    %218 = vector.extract_strided_slice %0 {offsets = [18, 0], sizes = [1, 16], strides = [1, 1]} : vector<20x128xf32> to vector<1x16xf32>
    %cst_67 = arith.constant dense<0.000000e+00> : vector<2xf32>
    %219 = vector.multi_reduction <add>, %216, %cst_67 [1] : vector<2x16xf32> to vector<2xf32>
    %220 = vector.shape_cast %219 : vector<2xf32> to vector<2x1xf32>
    %cst_68 = arith.constant 1.600000e+01 : f32
    %221 = vector.broadcast %cst_68 : f32 to vector<2x1xf32>
    %222 = arith.divf %220, %221 : vector<2x1xf32>
    %223 = arith.mulf %216, %216 : vector<2x16xf32>
    %cst_69 = arith.constant dense<0.000000e+00> : vector<2xf32>
    %224 = vector.multi_reduction <add>, %223, %cst_69 [1] : vector<2x16xf32> to vector<2xf32>
    %225 = vector.shape_cast %224 : vector<2xf32> to vector<2x1xf32>
    %cst_70 = arith.constant 1.600000e+01 : f32
    %226 = vector.broadcast %cst_70 : f32 to vector<2x1xf32>
    %227 = arith.divf %225, %226 : vector<2x1xf32>
    %228 = arith.mulf %222, %222 : vector<2x1xf32>
    %229 = arith.subf %227, %228 : vector<2x1xf32>
    %cst_71 = arith.constant 0.000000e+00 : f32
    %230 = vector.broadcast %cst_71 : f32 to vector<2x1xf32>
    %231 = arith.maximumf %229, %230 : vector<2x1xf32>
    %232 = vector.broadcast %222 : vector<2x1xf32> to vector<2x16xf32>
    %233 = arith.subf %216, %232 : vector<2x16xf32>
    %cst_72 = arith.constant 9.99999974E-6 : f32
    %234 = vector.broadcast %cst_72 : f32 to vector<2x1xf32>
    %235 = arith.addf %231, %234 : vector<2x1xf32>
    %236 = math.rsqrt %235 : vector<2x1xf32>
    %237 = vector.broadcast %236 : vector<2x1xf32> to vector<2x16xf32>
    %238 = arith.mulf %233, %237 : vector<2x16xf32>
    %239 = vector.broadcast %217 : vector<1x16xf32> to vector<2x16xf32>
    %240 = arith.mulf %238, %239 : vector<2x16xf32>
    %241 = vector.broadcast %218 : vector<1x16xf32> to vector<2x16xf32>
    %242 = arith.addf %240, %241 : vector<2x16xf32>
    %cst_73 = arith.constant 0.000000e+00 : f32
    %243 = vector.broadcast %cst_73 : f32 to vector<2x16xf32>
    %244 = arith.maximumf %242, %243 : vector<2x16xf32>
    %245 = arith.truncf %244 : vector<2x16xf32> to vector<2x16xbf16>
    %c384 = arith.constant 384 : index
    %c0_74 = arith.constant 0 : index
    %246 = vector.load %arg4[%c384, %c0_74] : memref<400x128xbf16, #tpu.memory_space<vmem>>, vector<16x2xbf16>
    %cst_75 = arith.constant dense<0.000000e+00> : vector<2x2xf32>
    %247 = tpu.matmul %245, %246, %cst_75 {dimension_numbers = #tpu.dot_dimension_numbers<[1], [0], [0], [1], [0, 0, 1, 1], [], []>} : vector<2x16xbf16>, vector<16x2xbf16>, vector<2x2xf32> -> vector<2x2xf32>
    %248 = vector.extract_strided_slice %0 {offsets = [19, 0], sizes = [1, 2], strides = [1, 1]} : vector<20x128xf32> to vector<1x2xf32>
    %249 = vector.broadcast %248 : vector<1x2xf32> to vector<2x2xf32>
    %250 = arith.addf %247, %249 : vector<2x2xf32>
    %c0_76 = arith.constant 0 : index
    %c0_77 = arith.constant 0 : index
    %251 = vector.load %arg6[%c0_76, %c0_77] : memref<2x2xf32, #tpu.memory_space<vmem>>, vector<2x2xf32>
    tpu.vector_store %arg6[%c0_76, %c0_77], %250 {strides = array<i32>} : memref<2x2xf32, #tpu.memory_space<vmem>>, vector<2x2xf32>,
    return
  }
}

</mosaic_0001>

<bundles_post_ra>
// kernel: tpu_custom_call.1
= control target key start
LH: loop header
LB: loop body
LE: loop exit
PB: predicated region body
PF: predicated region fallthrough
CT: control target
= control target key end

     0   :  { %11 = vsyncpa [#allocation3], 0  ;;  %s1988_s0 = inlined_call_operand.hbm [shape: bf16[32,32], index: 0, kind: input, shape index: {}]   ;;  %s1989_s1 = inlined_call_operand.vmem [shape: bf16[32,8], index: 1, kind: input, shape index: {}]   ;;  %s1990_s2 = inlined_call_operand.vmem [shape: s32[1,32], index: 2, kind: input, shape index: {}]   ;;  %s1991_s3 = inlined_call_operand.vmem [shape: f32[2,4], index: 3, kind: input, shape index: {}]   ;;  %s1992_s4 = inlined_call_operand.hbm [shape: bf16[400,128], index: 4, kind: input, shape index: {}]   ;;  %s1993_s5 = inlined_call_operand.vmem [shape: f32[20,128], index: 5, kind: input, shape index: {}]   ;;  %s1994_s6 = inlined_call_operand.hbm [shape: f32[2,2], index: 6, kind: output, shape index: {}]  }
   0x1   :  { %12 = vsyncpa [#allocation6], 0 }
   0x2   :  { %13 = vsyncpa [#allocation4], 0  ;;  %s1655_s21 = smov [#allocation2]   ;;  %s1583_s25 = scalar_lea.hbm %s1988_s0, 256 }
   0x3   :  { %s19_s22 = sshll.u32 %s1655_s21, 4  ;;  %p1584_p0 = scmp.ne.s32.totalorder %s1988_s0, %s1583_s25  ;;  %s20_s22 = int_to_ptr.vmem [resolvable:$true] %s19_s22 }
   0x4   :  { %p1587_p1 = scmp.lt.u32.totalorder %s1583_s25, %s1988_s0 }
   0x6   :  { %p1589_p2 = pnand %p1587_p1, %p1584_p0 }
   0x8   :  { %1592 = shalt.err (!%p1589_p2)
}
   0x9   :  { %s1593_s30 = scalar_lea.vmem %s20_s22, 256  ;;  %p1598_p4 = scmp.lt.s32.totalorder %s20_s22, %s20_s22 }
   0xa   :  { %p1594_p3 = scmp.ne.s32.totalorder %s20_s22, %s1593_s30  ;;  %p1599_p5 = scmp.lt.s32.totalorder %s1593_s30, %s1593_s30 }
   0xc   :  { %p1600_p6 = por %p1599_p5, %p1598_p4 }
   0xe   :  { %p1601_p7 = pnand %p1600_p6, %p1594_p3 }
  0x10   :  { %1604 = shalt.err (!%p1601_p7)
}
  0x11   :  { %s1656_s7 = smov 64   ;;  %s1657_s8 = smov 4  }
  0x12   :  { %25 = dma.hbm_to_vmem [thread:$0]  %s1988_s0, 256, %s20_s22, [#allocation3], %s1656_s7, %s1656_s7, %s1657_s8  }
  0x13   :  { %s1658_s11 = smov [#allocation5]   ;;  %s1605_s15 = scalar_lea.hbm %s1992_s4, 3200 }
  0x14   :  { %s37_s12 = sshll.u32 %s1658_s11, 4  ;;  %p1606_p8 = scmp.ne.s32.totalorder %s1992_s4, %s1605_s15  ;;  %s38_s12 = int_to_ptr.vmem [resolvable:$true] %s37_s12 }
  0x15   :  { %p1609_p9 = scmp.lt.u32.totalorder %s1605_s15, %s1992_s4 }
  0x17   :  { %p1611_p10 = pnand %p1609_p9, %p1606_p8 }
  0x19   :  { %1614 = shalt.err (!%p1611_p10)
}
  0x1a   :  { %s1615_s20 = scalar_lea.vmem %s38_s12, 3200  ;;  %p1620_p12 = scmp.lt.s32.totalorder %s38_s12, %s38_s12 }
  0x1b   :  { %p1616_p11 = scmp.ne.s32.totalorder %s38_s12, %s1615_s20  ;;  %p1621_p13 = scmp.lt.s32.totalorder %s1615_s20, %s1615_s20 }
  0x1d   :  { %p1622_p0 = por %p1621_p13, %p1620_p12 }
  0x1f   :  { %p1623_p1 = pnand %p1622_p0, %p1616_p11 }
  0x21   :  { %1626 = shalt.err (!%p1623_p1)
}
  0x22   :  { %43 = dma.hbm_to_vmem [thread:$0]  %s1992_s4, 3200, %s38_s12, [#allocation6], %s1656_s7, %s1656_s7, %s1657_s8  }
  0x23   :  { %1649 = dma.done.wait [#allocation3], 256  }
  0x24   :  { %1650 = vsyncadd [#allocation3], 4294967040 }
  0x25   :  { %1651 = dma.done.wait [#allocation6], 3200  }
  0x26   :  { %1652 = vsyncadd [#allocation6], 4294964096  ;;  %v60_v0 = vld [vmem:[%s1989_s1] sm:$0xff]   ;;  %v62_v1 = vld [vmem:[%s1989_s1 + $0x8] sm:$0xff]   ;;  %vm104_vm0 = vcmask 261120   ;;  %s1659_s4 = smov 8   ;;  %v65_v27 = vlaneseq }
  0x27   :  { %v1730_v2 = vld [vmem:[#allocation2] sm:$0xff]   ;;  %v160_v3 = vunpack.c.l.bf16 %v60_v0  ;;  %v161_v4 = vunpack.c.h.bf16 %v60_v0  ;;  %v162_v5 = vunpack.c.l.bf16 %v62_v1  ;;  %v163_v6 = vunpack.c.h.bf16 %v62_v1  ;;  %1379 = vmatprep.subr.bf16.mxu0 %v60_v0  ;;  %v1734_v8 = vld [vmem:[#allocation2 + $0x8] sm:$0xff]   ;;  %v1529_v10 = vld [vmem:[#allocation5] sm:$0xff]   ;;  %s1661_s30 = smov 32   ;;  %s1663_s8 = smov 96  }
  0x28   :  { %1383 = vmatprep.mubr.msk.bf16.mxu0 %vm104_vm0, %v1730_v2  ;;  %1380 = vmatpush3.bf16.msra.mxu0 %v60_v0  ;;  %vm180_vm1 = vcmask 64512   ;;  %vm199_vm2 = vcmask 130048   ;;  %v1740_v28 = vshrl.u32 %v65_v27, 7  ;;  %v1748_v30 = vld [vmem:[%s1993_s5] sm:$0xff]  ;;  %v1660_v53 = vmov 0.0   ;;  %v1530_v56 = vld [vmem:[#allocation5 + $0x28] sm:$0xff]  }
  0x29   :  { %v1505_v7 = vpack.i.bf16 %v161_v4, %v160_v3  ;;  %1381 = vmatprep.subr.bf16.mxu0 %v62_v1  ;;  %v1510_v9 = vpack.i.bf16 %v163_v6, %v162_v5  ;;  %1387 = vmatprep.subr.bf16.mxu1 %v1529_v10  ;;  %v1282_v52 = vld [vmem:[%s1990_s2] ss:$0 sm:$0xff]  ;;  %vm75_vm4 = vcmask 254976   ;;  %v1532_v58 = vld [vmem:[#allocation5 + $0x38] ss:$0 sps:$4 sm:$0x33]  }
  0x2a   :  { %1388 = vmatpush3.bf16.msra.mxu1 %v1529_v10  ;;  %v1743_v29 = vsub.s32 0, %v1740_v28  ;;  %vm72_vm3 = vcmp.eq.s32.totalorder %v1282_v52, %v1740_v28  ;;  %v1531_v57 = vld [vmem:[#allocation5 + $0x30] sm:$0xff]   ;;  %vm420_vm5 = vcmask 1041408   ;;  %vm1662_vm6 = vmmov 0  }
  0x2b   :  { %1506 = vrot.lane.b32.xlu0 %v1505_v7, %s1659_s4  ;;  %v1785_v54 = vsel %vm72_vm3, 1.0, %v1660_v53  ;;  %1393 = vmatprep.subr.bf16.mxu1 %v1660_v53  ;;  %v422_v59 = vsel %vm420_vm5, %v1532_v58, 0  ;;  %v1797_v60 = vld [vmem:[%s1991_s3] sm:$0x3]  ;;  %vm416_vm7 = vcmask 293888   ;;  %vm464_vm8 = vcmask 517120  }
  0x2c   :  { %1382 = vmatpush3.bf16.msra.mxu0 %v62_v1  ;;  %v192_v31 = vrot.slane %v1748_v30, %v1743_v29  ;;  %v76_v55 = vsel %vm75_vm4, %v1785_v54, 0.0  ;;  %vm530_vm9 = vcmask 523264   ;;  %vm875_vm10 = vcmask 785408  }
  0x2d   :  { %1401 = vmatprep.subr.bf16.mxu0 %v1660_v53  ;;  %vm934_vm11 = vcmask 818176   ;;  %vm1179_vm12 = vcmask 123904   ;;  %vm1264_vm13 = vcmask 9216  }
  0x2f   :  { %1511 = vrot.lane.b32.xlu0 %v1510_v9, %s1659_s4  ;;  %1384 = vmatmul.mubr.msk.bf16.vlgmr.msra.gmra.mrb[0].mxu0 %vm104_vm0, %v1734_v8 }
  0x30   :  { %1402 = vmatpush3.bf16.msra.mxu0 %v1530_v56  ;;  %1407 = vmatprep.mubr.msk.bf16.mxu0 %vm1662_vm6, %v1660_v53 }
  0x31   :  { %1403 = vmatprep.subr.bf16.mxu0 %v1660_v53 }
  0x34   :  { %1404 = vmatpush3.bf16.msra.mxu0 %v1531_v57 }
  0x35   :  { %1405 = vmatprep.subr.bf16.mxu0 %v1660_v53 }
  0x38   :  { %1406 = vmatpush3.bf16.msra.mxu0 %v422_v59 }
  0x9d   :  { %v1507_v11 = vpop.permute.xlu0 %1506 }
  0x9e   :  { %v1508_v15 = vunpack.i.l.bf16 %v1507_v11  ;;  %v1509_v18 = vunpack.i.h.bf16 %v1507_v11 }
  0xa1   :  { %v1512_v12 = vpop.permute.xlu0 %1511 }
  0xa2   :  { %v1514_v13 = vunpack.i.h.bf16 %v1512_v12  ;;  %v1513_v14 = vunpack.i.l.bf16 %v1512_v12 }
 0x102   :  { %v1385_v16 = vpop.f32.mrb[0].mxu0 }
 0x103   :  { %v145_v17 = vpop.f32.mrb[1].mxu0  ;;  %v183_v20 = vsel %vm180_vm1, %v1385_v16, %v1513_v14 }
 0x104   :  { %v1386_v19 = vpop.f32.mrb[2].mxu0  ;;  %v181_v23 = vsel %vm180_vm1, %v145_v17, %v1508_v15 }
 0x105   :  { %v184_v21 = vsel %vm180_vm1, %v1386_v19, %v1514_v13  ;;  %v148_v22 = vpop.f32.mrb[3].mxu0 }
 0x106   :  { %v186_v24 = vpack.c.bf16 %v184_v21, %v183_v20  ;;  %v182_v25 = vsel %vm180_vm1, %v148_v22, %v1509_v18 }
 0x107   :  { %v185_v26 = vpack.c.bf16 %v182_v25, %v181_v23 }
 0x109   :  { %1389 = vmatprep.mubr.msk.bf16.mxu1 %vm199_vm2, %v185_v26 }
 0x10a   :  { %1390 = vmatmul.mubr.msk.bf16.vlgmr.msra.gmra.mrb[0].mxu1 %vm199_vm2, %v186_v24 }
 0x10b   :  { %1397 = vmatprep.mubr.msk.bf16.mxu1 %vm1662_vm6, %v1660_v53 }
 0x1dd   :  { %v1391_v32 = vpop.f32.mrb[0].mxu1 }
 0x1de   :  { %v240_v33 = vpop.f32.mrb[1].mxu1  ;;  %v1761_v41 = vadd.f32 %v1391_v32, %v192_v31 }
 0x1df   :  { %v1752_v34 = vadd.f32 %v240_v33, %v192_v31  ;;  %v1392_v35 = vpop.f32.mrb[2].mxu1  ;;  %v1806_v33 = vsub.s32 1, %v1740_v28 }
 0x1e0   :  { %v243_v36 = vpop.f32.mrb[3].mxu1  ;;  %v1765_v43 = vadd.f32 %v1392_v35, %v192_v31  ;;  %v261_v44 = vsel %vm104_vm0, %v1761_v41, 0.0  ;;  %v274_v46 = vmul.f32 %v1761_v41, %v1761_v41 }
 0x1e1   :  { %v1754_v37 = vadd.f32 %v243_v36, %v192_v31  ;;  %v255_v38 = vsel %vm104_vm0, %v1752_v34, 0.0  ;;  %v272_v39 = vmul.f32 %v1752_v34, %v1752_v34 }
 0x1e2   :  { %256 = vadd.xlane.f32.xlu1 %v255_v38  ;;  %v264_v45 = vsel %vm104_vm0, %v1765_v43, 0.0  ;;  %v282_v47 = vsel %vm104_vm0, %v274_v46, 0.0  ;;  %v275_v50 = vmul.f32 %v1765_v43, %v1765_v43 }
 0x1e3   :  { %v276_v40 = vsel %vm104_vm0, %v272_v39, 0.0  ;;  %v258_v42 = vsel %vm104_vm0, %v1754_v37, 0.0  ;;  %v273_v48 = vmul.f32 %v1754_v37, %v1754_v37 }
 0x1e4   :  { %277 = vadd.xlane.f32.xlu0 %v276_v40  ;;  %v285_v51 = vsel %vm104_vm0, %v275_v50, 0.0  ;;  %v323_v40 = vrot.slane %v1748_v30, %v1806_v33 }
 0x1e5   :  { %v279_v49 = vsel %vm104_vm0, %v273_v48, 0.0 }
 0x1e6   :  { %259 = vadd.xlane.f32.xlu1 %v258_v42  ;;  %v1812_v42 = vsub.s32 2, %v1740_v28 }
 0x1ea   :  { %262 = vadd.xlane.f32.xlu1 %v261_v44 }
 0x1ee   :  { %265 = vadd.xlane.f32.xlu1 %v264_v45 }
 0x1f2   :  { %283 = vadd.xlane.f32.xlu1 %v282_v47 }
 0x1f6   :  { %280 = vadd.xlane.f32.xlu1 %v279_v49  ;;  %v331_v49 = vrot.slane %v1748_v30, %v1812_v42 }
 0x1fa   :  { %286 = vadd.xlane.f32.xlu1 %v285_v51 }
 0x1fe   :  { %77 = vadd.xlane.f32.xlu1 %v76_v55 }
 0x20f   :  { %387 = vrot.lane.b32.xlu1 %v1797_v60, %s1661_s30 }
 0x26f   :  { %v257_v61 = vpop.xlane.xlu1 %256 }
 0x270   :  { %v268_v62 = vmul.f32 0.03125, %v257_v61 }
 0x271   :  { %v278_v63 = vpop.xlane.xlu0 %277 }
 0x272   :  { %v292_v1 = vmul.f32 %v268_v62, %v268_v62  ;;  %v288_v3 = vmul.f32 0.03125, %v278_v63  ;;  %v304_v38 = vsub.f32 %v1752_v34, %v268_v62 }
 0x273   :  { %v260_v0 = vpop.xlane.xlu1 %259 }
 0x274   :  { %v296_v5 = vsub.f32 %v288_v3, %v292_v1  ;;  %v269_v10 = vmul.f32 0.03125, %v260_v0 }
 0x276   :  { %v300_v7 = vmax.f32 %v296_v5, 0.0  ;;  %v293_v16 = vmul.f32 %v269_v10, %v269_v10  ;;  %v305_v46 = vsub.f32 %v1754_v37, %v269_v10  ;;  %v1822_v5 = vpack.c.bf16 %v1785_v54, %v1785_v54 }
 0x277   :  { %v263_v4 = vpop.xlane.xlu1 %262 }
 0x278   :  { %v270_v9 = vmul.f32 0.03125, %v263_v4  ;;  %v308_v12 = vadd.f32 1e-05, %v300_v7 }
 0x27a   :  { %v294_v13 = vmul.f32 %v270_v9, %v270_v9  ;;  %1557 = vrsqrt.f32 %v308_v12  ;;  %v306_v45 = vsub.f32 %v1761_v41, %v270_v9 }
 0x27b   :  { %v266_v6 = vpop.xlane.xlu1 %265 }
 0x27c   :  { %v271_v18 = vmul.f32 0.03125, %v266_v6 }
 0x27e   :  { %v295_v24 = vmul.f32 %v271_v18, %v271_v18  ;;  %v307_v51 = vsub.f32 %v1765_v43, %v271_v18  ;;  %v1533_v18 = vld [vmem:[#allocation5 + $0x8] sm:$0xff]  }
 0x27f   :  { %v284_v11 = vpop.xlane.xlu1 %283 }
 0x280   :  { %v290_v14 = vmul.f32 0.03125, %v284_v11 }
 0x282   :  { %v298_v15 = vsub.f32 %v290_v14, %v294_v13 }
 0x283   :  { %v281_v17 = vpop.xlane.xlu1 %280 }
 0x284   :  { %v302_v19 = vmax.f32 %v298_v15, 0.0  ;;  %v289_v20 = vmul.f32 0.03125, %v281_v17  ;;  %v1558_v35 = vpop.eup %1557 }
 0x285   :  { %v316_v39 = vmul.f32 %v1558_v35, %v304_v38 }
 0x286   :  { %v310_v21 = vadd.f32 1e-05, %v302_v19  ;;  %v297_v22 = vsub.f32 %v289_v20, %v293_v16  ;;  %v1534_v19 = vld [vmem:[#allocation5 + $0x10] sm:$0xff]   ;;  %v1535_v20 = vld [vmem:[#allocation5 + $0x18] sm:$0xff]  }
 0x287   :  { %v287_v23 = vpop.xlane.xlu1 %286  ;;  %v324_v48 = vmul.f32 %v323_v40, %v316_v39 }
 0x288   :  { %1559 = vrsqrt.f32 %v310_v21  ;;  %v301_v25 = vmax.f32 %v297_v22, 0.0  ;;  %v291_v26 = vmul.f32 0.03125, %v287_v23  ;;  %v1536_v21 = vld [vmem:[#allocation5 + $0x20] sm:$0xff]  }
 0x289   :  { %v332_v55 = vadd.f32 %v331_v49, %v324_v48 }
 0x28a   :  { %v309_v27 = vadd.f32 1e-05, %v301_v25  ;;  %v299_v31 = vsub.f32 %v291_v26, %v295_v24 }
 0x28b   :  { %v336_v61 = vmax.f32 %v332_v55, 0.0  ;;  %v78_v7 = vpop.xlane.xlu1 %77 }
 0x28c   :  { %1561 = vrsqrt.f32 %v309_v27  ;;  %v303_v32 = vmax.f32 %v299_v31, 0.0  ;;  %v79_v9 = vmax.f32 %v78_v7, 1.0 }
 0x28e   :  { %v311_v36 = vadd.f32 1e-05, %v303_v32 }
 0x28f   :  { %v388_v13 = vpop.permute.xlu1 %387 }
 0x290   :  { %1563 = vrsqrt.f32 %v311_v36 }
 0x291   :  { %1565 = vrcp.f32 %v79_v9 }
 0x292   :  { %v1560_v44 = vpop.eup %1559 }
 0x293   :  { %v318_v47 = vmul.f32 %v1560_v44, %v306_v45 }
 0x295   :  { %v326_v56 = vmul.f32 %v323_v40, %v318_v47 }
 0x296   :  { %v1562_v50 = vpop.eup %1561 }
 0x297   :  { %v317_v34 = vmul.f32 %v1562_v50, %v305_v46  ;;  %v334_v63 = vadd.f32 %v331_v49, %v326_v56  ;;  %v1537_v56 = vld [vmem:[#allocation5 + $0x3c] sm:$0xff]  }
 0x299   :  { %v325_v52 = vmul.f32 %v323_v40, %v317_v34  ;;  %v338_v1 = vmax.f32 %v334_v63, 0.0 }
 0x29a   :  { %v1564_v57 = vpop.eup %1563 }
 0x29b   :  { %v319_v58 = vmul.f32 %v1564_v57, %v307_v51  ;;  %v333_v59 = vadd.f32 %v331_v49, %v325_v52  ;;  %v1831_v10 = vpop.eup %1565  ;;  %v1538_v57 = vld [vmem:[#allocation5 + $0x44] sm:$0xff]  }
 0x29d   :  { %v337_v62 = vmax.f32 %v333_v59, 0.0  ;;  %v327_v41 = vmul.f32 %v323_v40, %v319_v58  ;;  %v1539_v58 = vld [vmem:[#allocation5 + $0x4c] sm:$0xff]   ;;  %v1540_v59 = vld [vmem:[#allocation5 + $0x54] sm:$0xff]  }
 0x29f   :  { %v340_v37 = vpack.c.bf16 %v337_v62, %v336_v61  ;;  %v335_v0 = vadd.f32 %v331_v49, %v327_v41  ;;  %v1515_v4 = vpack.i.bf16 %v337_v62, %v336_v61 }
 0x2a1   :  { %1394 = vmatpush3.bf16.msra.mxu1 %v340_v37  ;;  %1423 = vmatprep.subr.bf16.mxu0 %v340_v37  ;;  %v339_v3 = vmax.f32 %v335_v0, 0.0 }
 0x2a2   :  { %1395 = vmatprep.subr.bf16.mxu1 %v1660_v53  ;;  %1516 = vrot.lane.b32.xlu0 %v1515_v4, %s1661_s30  ;;  %v484_v4 = vsub.s32 7, %v1740_v28 }
 0x2a3   :  { %v341_v43 = vpack.c.bf16 %v339_v3, %v338_v1  ;;  %v1520_v6 = vpack.i.bf16 %v339_v3, %v338_v1 }
 0x2a4   :  { %v485_v7 = vrot.slane %v1748_v30, %v484_v4 }
 0x2a5   :  { %1396 = vmatpush3.bf16.msra.mxu1 %v341_v43  ;;  %1521 = vrot.lane.b32.xlu1 %v1520_v6, %s1661_s30 }
 0x2a6   :  { %1411 = vmatprep.subr.bf16.mxu1 %v1660_v53 }
 0x2a8   :  { %1398 = vmatmul.mubr.msk.bf16.vlgmr.msra.gmra.mrb[4].mxu1 %vm104_vm0, %v1822_v5 }
 0x2a9   :  { %1419 = vmatprep.mubr.msk.bf16.mxu1 %vm1662_vm6, %v1660_v53  ;;  %1412 = vmatpush3.bf16.msra.mxu1 %v1537_v56 }
 0x2aa   :  { %1413 = vmatprep.subr.bf16.mxu1 %v1660_v53 }
 0x2ad   :  { %1414 = vmatpush3.bf16.msra.mxu1 %v1538_v57 }
 0x2ae   :  { %1415 = vmatprep.subr.bf16.mxu1 %v1660_v53 }
 0x2b1   :  { %1416 = vmatpush3.bf16.msra.mxu1 %v1539_v58 }
 0x2b2   :  { %1417 = vmatprep.subr.bf16.mxu1 %v1660_v53 }
 0x2b5   :  { %1418 = vmatpush3.bf16.msra.mxu1 %v1540_v59 }
 0x2b6   :  { %1443 = vmatprep.subr.bf16.mxu1 %v1660_v53 }
 0x314   :  { %v1517_v36 = vpop.permute.xlu0 %1516 }
 0x315   :  { %v1519_v45 = vunpack.i.h.bf16 %v1517_v36  ;;  %v1518_v46 = vunpack.i.l.bf16 %v1517_v36 }
 0x317   :  { %v1522_v35 = vpop.permute.xlu1 %1521 }
 0x318   :  { %v1524_v39 = vunpack.i.h.bf16 %v1522_v35  ;;  %v1523_v40 = vunpack.i.l.bf16 %v1522_v35 }
 0x37b   :  { %v379_v54 = vpop.f32.mrb[4].mxu1 }
 0x37c   :  { %v385_v11 = vmul.f32 %v1831_v10, %v379_v54  ;;  %v1399_v12 = vpop.f32.mrb[5].mxu1 }
 0x37d   :  { %v382_v14 = vpop.f32.mrb[6].mxu1 }
 0x37e   :  { %v390_v15 = vsel %vm104_vm0, %v385_v11, %v388_v13  ;;  %v1400_v16 = vpop.f32.mrb[7].mxu1 }
 0x37f   :  { %v391_v17 = vpack.c.bf16 %v390_v15, %v390_v15  ;;  %v1873_v16 = vsub.s32 3, %v1740_v28 }
 0x381   :  { %1408 = vmatmul.mubr.msk.bf16.vlgmr.msra.gmra.mrb[4].mxu0 %vm416_vm7, %v391_v17  ;;  %v660_v17 = vrot.slane %v1748_v30, %v1873_v16 }
 0x382   :  { %1424 = vmatpush3.bf16.msra.mxu0 %v340_v37  ;;  %1427 = vmatprep.mubr.msk.bf16.mxu0 %vm104_vm0, %v1730_v2  ;;  %v399_v2 = vsub.s32 6, %v1740_v28 }
 0x383   :  { %1425 = vmatprep.subr.bf16.mxu0 %v341_v43 }
 0x386   :  { %1426 = vmatpush3.bf16.msra.mxu0 %v341_v43  ;;  %v1862_v43 = vld [vmem:[%s1993_s5 + $0x8] sm:$0xff] }
 0x387   :  { %1431 = vmatprep.subr.bf16.mxu0 %v1533_v18  ;;  %v490_v11 = vrot.slane %v1862_v43, %v1743_v29 }
 0x389   :  { %1428 = vmatmul.mubr.msk.bf16.vlgmr.msra.gmra.mrb[8].mxu0 %vm104_vm0, %v1734_v8  ;;  %v400_v8 = vrot.slane %v1748_v30, %v399_v2 }
 0x38a   :  { %1432 = vmatpush3.bf16.msra.mxu0 %v1533_v18 }
 0x38b   :  { %1433 = vmatprep.subr.bf16.mxu0 %v1534_v19 }
 0x38e   :  { %1434 = vmatpush3.bf16.msra.mxu0 %v1534_v19 }
 0x38f   :  { %1435 = vmatprep.subr.bf16.mxu0 %v1535_v20 }
 0x392   :  { %1436 = vmatpush3.bf16.msra.mxu0 %v1535_v20 }
 0x393   :  { %1437 = vmatprep.subr.bf16.mxu0 %v1536_v21 }
 0x396   :  { %1438 = vmatpush3.bf16.msra.mxu0 %v1536_v21 }
 0x397   :  { %1469 = vmatprep.subr.bf16.mxu0 %v1660_v53 }
 0x454   :  { %v458_v22 = vpop.f32.mrb[4].mxu0 }
 0x455   :  { %v459_v23 = vadd.f32 %v458_v22, %v400_v8  ;;  %v1409_v24 = vpop.f32.mrb[5].mxu0 }
 0x456   :  { %v461_v25 = vpop.f32.mrb[6].mxu0 }
 0x457   :  { %v1410_v26 = vpop.f32.mrb[7].mxu0  ;;  %v465_v27 = vsel %vm464_vm8, %v459_v23, 0.0  ;;  %v470_v31 = vmul.f32 %v459_v23, %v459_v23 }
 0x458   :  { %466 = vadd.xlane.f32.xlu1 %v465_v27 }
 0x459   :  { %v471_v32 = vsel %vm464_vm8, %v470_v31, 0.0 }
 0x45a   :  { %472 = vadd.xlane.f32.xlu0 %v471_v32 }
 0x45c   :  { %v1429_v38 = vpop.f32.mrb[8].mxu0 }
 0x45d   :  { %v608_v44 = vpop.f32.mrb[9].mxu0  ;;  %v645_v48 = vsel %vm104_vm0, %v1429_v38, %v1523_v40 }
 0x45e   :  { %v1430_v47 = vpop.f32.mrb[10].mxu0  ;;  %v643_v34 = vsel %vm104_vm0, %v608_v44, %v1518_v46 }
 0x45f   :  { %v646_v49 = vsel %vm104_vm0, %v1430_v47, %v1524_v39  ;;  %v611_v50 = vpop.f32.mrb[11].mxu0 }
 0x460   :  { %v648_v51 = vpack.c.bf16 %v646_v49, %v645_v48  ;;  %v644_v52 = vsel %vm104_vm0, %v611_v50, %v1519_v45 }
 0x461   :  { %v647_v55 = vpack.c.bf16 %v644_v52, %v643_v34 }
 0x463   :  { %1439 = vmatprep.mubr.msk.bf16.mxu0 %vm530_vm9, %v647_v55 }
 0x464   :  { %1440 = vmatmul.mubr.msk.bf16.vlgmr.msra.gmra.mrb[12].mxu0 %vm530_vm9, %v648_v51 }
 0x465   :  { %1477 = vmatprep.mubr.msk.bf16.mxu0 %vm1662_vm6, %v1660_v53 }
 0x4e5   :  { %v467_v61 = vpop.xlane.xlu1 %466 }
 0x4e6   :  { %v469_v62 = vmul.f32 0.015625, %v467_v61 }
 0x4e7   :  { %v473_v41 = vpop.xlane.xlu0 %472 }
 0x4e8   :  { %v475_v63 = vmul.f32 %v469_v62, %v469_v62  ;;  %v474_v37 = vmul.f32 0.015625, %v473_v41  ;;  %v478_v6 = vsub.f32 %v459_v23, %v469_v62 }
 0x4ea   :  { %v476_v0 = vsub.f32 %v474_v37, %v475_v63 }
 0x4ec   :  { %v477_v1 = vmax.f32 %v476_v0, 0.0 }
 0x4ee   :  { %v479_v3 = vadd.f32 1e-05, %v477_v1 }
 0x4f0   :  { %1567 = vrsqrt.f32 %v479_v3 }
 0x4fa   :  { %v1568_v9 = vpop.eup %1567 }
 0x4fb   :  { %v481_v54 = vmul.f32 %v1568_v9, %v478_v6 }
 0x4fd   :  { %v486_v12 = vmul.f32 %v485_v7, %v481_v54  ;;  %v505_v7 = vrot.slane %v1862_v43, %v1806_v33 }
 0x4ff   :  { %v491_v13 = vadd.f32 %v490_v11, %v486_v12 }
 0x501   :  { %v492_v14 = vmax.f32 %v491_v13, 0.0 }
 0x503   :  { %v493_v15 = vpack.c.bf16 %v492_v14, %v492_v14 }
 0x505   :  { %1420 = vmatmul.mubr.msk.bf16.vlgmr.msra.gmra.mrb[8].mxu1 %vm530_vm9, %v493_v15 }
 0x506   :  { %1447 = vmatprep.mubr.msk.bf16.mxu1 %vm1662_vm6, %v1660_v53 }
 0x537   :  { %v1441_v18 = vpop.f32.mrb[12].mxu0 }
 0x538   :  { %v1877_v19 = vadd.f32 %v1441_v18, %v660_v17  ;;  %v725_v20 = vpop.f32.mrb[13].mxu0 }
 0x539   :  { %v1442_v21 = vpop.f32.mrb[14].mxu0  ;;  %v1879_v8 = vadd.f32 %v725_v20, %v660_v17 }
 0x53a   :  { %v1881_v22 = vadd.f32 %v1442_v21, %v660_v17  ;;  %v728_v23 = vpop.f32.mrb[15].mxu0  ;;  %v746_v24 = vsel %vm104_vm0, %v1877_v19, 0.0  ;;  %v758_v38 = vmul.f32 %v1877_v19, %v1877_v19 }
 0x53b   :  { %747 = vadd.xlane.f32.xlu1 %v746_v24  ;;  %v1885_v25 = vadd.f32 %v728_v23, %v660_v17  ;;  %v740_v27 = vsel %vm104_vm0, %v1879_v8, 0.0  ;;  %v756_v31 = vmul.f32 %v1879_v8, %v1879_v8 }
 0x53c   :  { %v749_v26 = vsel %vm104_vm0, %v1881_v22, 0.0  ;;  %v759_v40 = vmul.f32 %v1881_v22, %v1881_v22  ;;  %v766_v44 = vsel %vm104_vm0, %v758_v38, 0.0 }
 0x53d   :  { %750 = vadd.xlane.f32.xlu0 %v749_v26  ;;  %v743_v32 = vsel %vm104_vm0, %v1885_v25, 0.0  ;;  %v757_v35 = vmul.f32 %v1885_v25, %v1885_v25  ;;  %v760_v36 = vsel %vm104_vm0, %v756_v31, 0.0  ;;  %v814_v31 = vsub.s32 5, %v1740_v28 }
 0x53e   :  { %v769_v45 = vsel %vm104_vm0, %v759_v40, 0.0 }
 0x53f   :  { %741 = vadd.xlane.f32.xlu1 %v740_v27  ;;  %v763_v39 = vsel %vm104_vm0, %v757_v35, 0.0  ;;  %v806_v27 = vsub.s32 4, %v1740_v28  ;;  %v815_v40 = vrot.slane %v1748_v30, %v814_v31 }
 0x541   :  { %744 = vadd.xlane.f32.xlu0 %v743_v32  ;;  %v807_v35 = vrot.slane %v1748_v30, %v806_v27 }
 0x543   :  { %761 = vadd.xlane.f32.xlu1 %v760_v36 }
 0x545   :  { %764 = vadd.xlane.f32.xlu0 %v763_v39 }
 0x547   :  { %767 = vadd.xlane.f32.xlu1 %v766_v44 }
 0x549   :  { %770 = vadd.xlane.f32.xlu0 %v769_v45 }
 0x55f   :  { %871 = vrot.lane.b32.xlu0 %v1797_v60, %s1663_s8 }
 0x5c8   :  { %v748_v46 = vpop.xlane.xlu1 %747 }
 0x5c9   :  { %v754_v52 = vmul.f32 0.03125, %v748_v46 }
 0x5ca   :  { %v751_v47 = vpop.xlane.xlu0 %750 }
 0x5cb   :  { %v755_v57 = vmul.f32 0.03125, %v751_v47  ;;  %v778_v63 = vmul.f32 %v754_v52, %v754_v52  ;;  %v790_v45 = vsub.f32 %v1877_v19, %v754_v52 }
 0x5cc   :  { %v742_v48 = vpop.xlane.xlu1 %741 }
 0x5cd   :  { %v752_v49 = vmul.f32 0.03125, %v742_v48  ;;  %v779_v3 = vmul.f32 %v755_v57, %v755_v57 }
 0x5ce   :  { %v745_v50 = vpop.xlane.xlu0 %744 }
 0x5cf   :  { %v753_v34 = vmul.f32 0.03125, %v745_v50  ;;  %v776_v55 = vmul.f32 %v752_v49, %v752_v49  ;;  %v788_v32 = vsub.f32 %v1879_v8, %v752_v49  ;;  %v791_v8 = vsub.f32 %v1881_v22, %v755_v57  ;;  %v1541_v22 = vld [vmem:[#allocation5 + $0x5c] sm:$0xff]   ;;  %v1542_v57 = vld [vmem:[#allocation5 + $0x64] sm:$0xff]  }
 0x5d0   :  { %v762_v51 = vpop.xlane.xlu1 %761 }
 0x5d1   :  { %v772_v56 = vmul.f32 0.03125, %v762_v51  ;;  %v777_v59 = vmul.f32 %v753_v34, %v753_v34  ;;  %v789_v38 = vsub.f32 %v1885_v25, %v753_v34 }
 0x5d2   :  { %v765_v58 = vpop.xlane.xlu0 %764 }
 0x5d3   :  { %v780_v61 = vsub.f32 %v772_v56, %v776_v55  ;;  %v773_v62 = vmul.f32 0.03125, %v765_v58 }
 0x5d4   :  { %v768_v41 = vpop.xlane.xlu1 %767 }
 0x5d5   :  { %v784_v37 = vmax.f32 %v780_v61, 0.0  ;;  %v781_v0 = vsub.f32 %v773_v62, %v777_v59  ;;  %v774_v1 = vmul.f32 0.03125, %v768_v41 }
 0x5d6   :  { %v771_v6 = vpop.xlane.xlu0 %770 }
 0x5d7   :  { %v792_v60 = vadd.f32 1e-05, %v784_v37  ;;  %v785_v9 = vmax.f32 %v781_v0, 0.0  ;;  %v782_v54 = vsub.f32 %v774_v1, %v778_v63  ;;  %v775_v11 = vmul.f32 0.03125, %v771_v6  ;;  %v1543_v37 = vld [vmem:[#allocation5 + $0x6c] sm:$0xff]   ;;  %v1544_v0 = vld [vmem:[#allocation5 + $0x74] sm:$0xff]  }
 0x5d8   :  { %v568_v12 = vpop.f32.mrb[8].mxu1  ;;  %v1545_v1 = vld [vmem:[#allocation5 + $0x7c] sm:$0xff]  }
 0x5d9   :  { %1569 = vrsqrt.f32 %v792_v60  ;;  %v793_v13 = vadd.f32 1e-05, %v785_v9  ;;  %v786_v14 = vmax.f32 %v782_v54, 0.0  ;;  %v783_v15 = vsub.f32 %v775_v11, %v779_v3  ;;  %v1421_v17 = vpop.f32.mrb[9].mxu1 }
 0x5da   :  { %v569_v18 = vadd.f32 %v568_v12, %v505_v7  ;;  %v571_v20 = vpop.f32.mrb[10].mxu1  ;;  %v1547_v3 = vld [vmem:[#allocation5 + $0x8c] ss:$0 sps:$4 sm:$0x33]   ;;  %v872_v54 = vpop.permute.xlu0 %871 }
 0x5db   :  { %1571 = vrsqrt.f32 %v793_v13  ;;  %v794_v21 = vadd.f32 1e-05, %v786_v14  ;;  %v787_v23 = vmax.f32 %v783_v15, 0.0  ;;  %v1422_v24 = vpop.f32.mrb[11].mxu1  ;;  %v939_v6 = vsel %vm420_vm5, %v1547_v3, 0 }
 0x5dc   :  { %868 = vrot.lane.b32.xlu1 %v569_v18, %s1661_s30  ;;  %v894_v18 = vrot.slane %v1862_v43, %v1812_v42 }
 0x5dd   :  { %1573 = vrsqrt.f32 %v794_v21  ;;  %v795_v26 = vadd.f32 1e-05, %v787_v23 }
 0x5df   :  { %1575 = vrsqrt.f32 %v795_v26 }
 0x5e3   :  { %v1570_v36 = vpop.eup %1569 }
 0x5e4   :  { %v800_v39 = vmul.f32 %v1570_v36, %v788_v32  ;;  %v1548_v36 = vld [vmem:[#allocation5 + $0x90] sm:$0xff]  }
 0x5e5   :  { %v1572_v44 = vpop.eup %1571  ;;  %1470 = vmatpush3.bf16.msra.mxu0 %v1548_v36 }
 0x5e6   :  { %v801_v46 = vmul.f32 %v1572_v44, %v789_v38  ;;  %v808_v47 = vmul.f32 %v807_v35, %v800_v39  ;;  %1471 = vmatprep.subr.bf16.mxu0 %v1660_v53  ;;  %v1549_v38 = vld [vmem:[#allocation5 + $0x98] sm:$0xff]   ;;  %v1550_v39 = vld [vmem:[#allocation5 + $0xa0] sm:$0xff]  }
 0x5e7   :  { %v1574_v48 = vpop.eup %1573 }
 0x5e8   :  { %v809_v49 = vmul.f32 %v807_v35, %v801_v46  ;;  %v816_v50 = vadd.f32 %v815_v40, %v808_v47  ;;  %v802_v51 = vmul.f32 %v1574_v48, %v790_v45 }
 0x5e9   :  { %v1576_v55 = vpop.eup %1575  ;;  %1472 = vmatpush3.bf16.msra.mxu0 %v1549_v38 }
 0x5ea   :  { %v817_v56 = vadd.f32 %v815_v40, %v809_v49  ;;  %v803_v58 = vmul.f32 %v1576_v55, %v791_v8  ;;  %v810_v25 = vmul.f32 %v807_v35, %v802_v51  ;;  %v820_v34 = vmax.f32 %v816_v50, 0.0  ;;  %1473 = vmatprep.subr.bf16.mxu0 %v1660_v53 }
 0x5eb   :  { %v1000_v55 = vrot.slane %v1862_v43, %v1873_v16 }
 0x5ec   :  { %v821_v59 = vmax.f32 %v817_v56, 0.0  ;;  %v811_v61 = vmul.f32 %v807_v35, %v803_v58  ;;  %v818_v62 = vadd.f32 %v815_v40, %v810_v25  ;;  %v1005_v25 = vrot.slane %v1862_v43, %v806_v27 }
 0x5ed   :  { %1474 = vmatpush3.bf16.msra.mxu0 %v1550_v39 }
 0x5ee   :  { %v824_v30 = vpack.c.bf16 %v821_v59, %v820_v34  ;;  %v819_v41 = vadd.f32 %v815_v40, %v811_v61  ;;  %v822_v19 = vmax.f32 %v818_v62, 0.0  ;;  %v1551_v40 = vld [vmem:[#allocation5 + $0xa8] sm:$0xff]   ;;  %1475 = vmatprep.subr.bf16.mxu0 %v1660_v53 }
 0x5f0   :  { %1444 = vmatpush3.bf16.msra.mxu1 %v824_v30  ;;  %v823_v52 = vmax.f32 %v819_v41, 0.0  ;;  %v1020_v30 = vrot.slane %v1862_v43, %v814_v31 }
 0x5f1   :  { %1445 = vmatprep.subr.bf16.mxu1 %v1660_v53  ;;  %1476 = vmatpush3.bf16.msra.mxu0 %v1551_v40 }
 0x5f2   :  { %v825_v63 = vpack.c.bf16 %v823_v52, %v822_v19  ;;  %1481 = vmatprep.subr.bf16.mxu0 %v1660_v53 }
 0x5f4   :  { %1446 = vmatpush3.bf16.msra.mxu1 %v825_v63 }
 0x5f5   :  { %1451 = vmatprep.subr.bf16.mxu1 %v1660_v53 }
 0x5f7   :  { %1448 = vmatmul.mubr.msk.bf16.vlgmr.msra.gmra.mrb[12].mxu1 %vm104_vm0, %v1822_v5  ;;  %v1546_v5 = vld [vmem:[#allocation5 + $0x84] sm:$0xff]  }
 0x5f8   :  { %1452 = vmatpush3.bf16.msra.mxu1 %v1541_v22  ;;  %1465 = vmatprep.mubr.msk.bf16.mxu1 %vm1662_vm6, %v1660_v53 }
 0x5f9   :  { %1453 = vmatprep.subr.bf16.mxu1 %v1660_v53 }
 0x5fc   :  { %1454 = vmatpush3.bf16.msra.mxu1 %v1542_v57 }
 0x5fd   :  { %1455 = vmatprep.subr.bf16.mxu1 %v1660_v53 }
 0x600   :  { %1456 = vmatpush3.bf16.msra.mxu1 %v1543_v37 }
 0x601   :  { %1457 = vmatprep.subr.bf16.mxu1 %v1660_v53 }
 0x604   :  { %1458 = vmatpush3.bf16.msra.mxu1 %v1544_v0  ;;  %v1552_v0 = vld [vmem:[#allocation5 + $0xb0] sm:$0xff]  }
 0x605   :  { %1459 = vmatprep.subr.bf16.mxu1 %v1660_v53 }
 0x608   :  { %1460 = vmatpush3.bf16.msra.mxu1 %v1545_v1  ;;  %v1553_v1 = vld [vmem:[#allocation5 + $0xb8] sm:$0xff]  }
 0x609   :  { %1461 = vmatprep.subr.bf16.mxu1 %v1660_v53 }
 0x60c   :  { %1462 = vmatpush3.bf16.msra.mxu1 %v1546_v5 }
 0x60d   :  { %1463 = vmatprep.subr.bf16.mxu1 %v1660_v53 }
 0x610   :  { %1464 = vmatpush3.bf16.msra.mxu1 %v939_v6 }
 0x611   :  { %1489 = vmatprep.subr.bf16.mxu1 %v1660_v53 }
 0x64e   :  { %v869_v11 = vpop.permute.xlu1 %868 }
 0x6ca   :  { %v860_v7 = vpop.f32.mrb[12].mxu1 }
 0x6cb   :  { %v866_v60 = vmul.f32 %v1831_v10, %v860_v7  ;;  %v1449_v9 = vpop.f32.mrb[13].mxu1 }
 0x6cc   :  { %v863_v12 = vpop.f32.mrb[14].mxu1 }
 0x6cd   :  { %v874_v13 = vsel %vm104_vm0, %v866_v60, %v869_v11  ;;  %v1450_v14 = vpop.f32.mrb[15].mxu1  ;;  %v1107_v11 = vrot.slane %v1862_v43, %v399_v2 }
 0x6ce   :  { %v876_v15 = vsel %vm875_vm10, %v874_v13, %v872_v54 }
 0x6cf   :  { %v877_v17 = vpack.c.bf16 %v876_v15, %v876_v15 }
 0x6d1   :  { %1466 = vmatmul.mubr.msk.bf16.vlgmr.msra.gmra.mrb[16].mxu1 %vm934_vm11, %v877_v17 }
 0x6d2   :  { %1491 = vmatprep.mubr.msk.bf16.mxu1 %vm1662_vm6, %v1660_v53 }
 0x7a4   :  { %v975_v20 = vpop.f32.mrb[16].mxu1 }
 0x7a5   :  { %v976_v10 = vadd.f32 %v975_v20, %v894_v18  ;;  %v1467_v21 = vpop.f32.mrb[17].mxu1 }
 0x7a6   :  { %v978_v23 = vpop.f32.mrb[18].mxu1 }
 0x7a7   :  { %v1468_v24 = vpop.f32.mrb[19].mxu1  ;;  %v981_v26 = vsel %vm464_vm8, %v976_v10, 0.0  ;;  %v985_v32 = vmul.f32 %v976_v10, %v976_v10 }
 0x7a8   :  { %982 = vadd.xlane.f32.xlu1 %v981_v26 }
 0x7a9   :  { %v986_v35 = vsel %vm464_vm8, %v985_v32, 0.0 }
 0x7aa   :  { %987 = vadd.xlane.f32.xlu0 %v986_v35  ;;  %v1554_v35 = vld [vmem:[#allocation5 + $0xc0] sm:$0xff]  }
 0x7ab   :  { %1490 = vmatpush3.bf16.msra.mxu1 %v1554_v35 }
 0x835   :  { %v983_v44 = vpop.xlane.xlu1 %982 }
 0x836   :  { %v984_v45 = vmul.f32 0.015625, %v983_v44 }
 0x837   :  { %v988_v46 = vpop.xlane.xlu0 %987 }
 0x838   :  { %v990_v47 = vmul.f32 %v984_v45, %v984_v45  ;;  %v989_v48 = vmul.f32 0.015625, %v988_v46  ;;  %v993_v51 = vsub.f32 %v976_v10, %v984_v45  ;;  %v55_v10 = vld [vmem:[%s1993_s5 + $0x10] sm:$0xf]  ;;  %s1664_s5 = smov [#allocation7]  }
 0x839   :  { %v1123_v21 = vrot.slane %v55_v10, %v1743_v29  ;;  %s1272_s11 = sshll.u32 %s1664_s5, 4  ;;  %s1273_s11 = int_to_ptr.vmem [resolvable:$true] %s1272_s11 }
 0x83a   :  { %v991_v8 = vsub.f32 %v989_v48, %v990_v47  ;;  %v1200_v47 = vrot.slane %v55_v10, %v1806_v33  ;;  %s1627_s12 = scalar_lea.vmem %s1273_s11, 32  ;;  %p1632_p3 = scmp.lt.s32.totalorder %s1273_s11, %s1273_s11 }
 0x83b   :  { %p1628_p2 = scmp.ne.s32.totalorder %s1273_s11, %s1627_s12  ;;  %p1633_p4 = scmp.lt.s32.totalorder %s1627_s12, %s1627_s12 }
 0x83c   :  { %v992_v49 = vmax.f32 %v991_v8, 0.0 }
 0x83d   :  { %p1634_p5 = por %p1633_p4, %p1632_p3 }
 0x83e   :  { %v994_v50 = vadd.f32 1e-05, %v992_v49  ;;  %v1205_v49 = vrot.slane %v55_v10, %v1812_v42 }
 0x83f   :  { %p1635_p6 = pnand %p1634_p5, %p1628_p2 }
 0x840   :  { %1577 = vrsqrt.f32 %v994_v50 }
 0x84a   :  { %v1578_v56 = vpop.eup %1577 }
 0x84b   :  { %v996_v58 = vmul.f32 %v1578_v56, %v993_v51 }
 0x84d   :  { %v1001_v34 = vmul.f32 %v1000_v55, %v996_v58 }
 0x84f   :  { %v1006_v59 = vadd.f32 %v1005_v25, %v1001_v34  ;;  %v1214_v25 = vrot.slane %v55_v10, %v1873_v16 }
 0x851   :  { %v1007_v61 = vmax.f32 %v1006_v59, 0.0 }
 0x853   :  { %v1008_v62 = vpack.c.bf16 %v1007_v61, %v1007_v61 }
 0x855   :  { %1478 = vmatmul.mubr.msk.bf16.vlgmr.msra.gmra.mrb[16].mxu0 %vm530_vm9, %v1008_v62 }
 0x856   :  { %1485 = vmatprep.mubr.msk.bf16.mxu0 %vm1662_vm6, %v1660_v53  ;;  %1482 = vmatpush3.bf16.msra.mxu0 %v1552_v0 }
 0x857   :  { %1483 = vmatprep.subr.bf16.mxu0 %v1660_v53  ;;  %v1112_v53 = vrot.slane %v1862_v43, %v484_v4 }
 0x85a   :  { %1484 = vmatpush3.bf16.msra.mxu0 %v1553_v1 }
 0x928   :  { %v1082_v41 = vpop.f32.mrb[16].mxu0 }
 0x929   :  { %v1083_v19 = vadd.f32 %v1082_v41, %v1020_v30  ;;  %v1479_v52 = vpop.f32.mrb[17].mxu0 }
 0x92a   :  { %v1085_v63 = vpop.f32.mrb[18].mxu0 }
 0x92b   :  { %v1480_v22 = vpop.f32.mrb[19].mxu0  ;;  %v1088_v27 = vsel %vm75_vm4, %v1083_v19, 0.0  ;;  %v1092_v57 = vmul.f32 %v1083_v19, %v1083_v19 }
 0x92c   :  { %1089 = vadd.xlane.f32.xlu1 %v1088_v27 }
 0x92d   :  { %v1093_v37 = vsel %vm75_vm4, %v1092_v57, 0.0 }
 0x92e   :  { %1094 = vadd.xlane.f32.xlu0 %v1093_v37 }
 0x9b9   :  { %v1090_v5 = vpop.xlane.xlu1 %1089 }
 0x9ba   :  { %v1091_v31 = vmul.f32 0.03125, %v1090_v5 }
 0x9bb   :  { %v1095_v3 = vpop.xlane.xlu0 %1094 }
 0x9bc   :  { %v1097_v6 = vmul.f32 %v1091_v31, %v1091_v31  ;;  %v1096_v7 = vmul.f32 0.03125, %v1095_v3  ;;  %v1100_v12 = vsub.f32 %v1083_v19, %v1091_v31 }
 0x9be   :  { %v1098_v60 = vsub.f32 %v1096_v7, %v1097_v6 }
 0x9c0   :  { %v1099_v9 = vmax.f32 %v1098_v60, 0.0 }
 0x9c2   :  { %v1101_v54 = vadd.f32 1e-05, %v1099_v9 }
 0x9c4   :  { %1579 = vrsqrt.f32 %v1101_v54 }
 0x9ce   :  { %v1580_v13 = vpop.eup %1579 }
 0x9cf   :  { %v1103_v14 = vmul.f32 %v1580_v13, %v1100_v12 }
 0x9d1   :  { %v1108_v15 = vmul.f32 %v1107_v11, %v1103_v14 }
 0x9d3   :  { %v1113_v17 = vadd.f32 %v1112_v53, %v1108_v15 }
 0x9d5   :  { %v1114_v18 = vmax.f32 %v1113_v17, 0.0 }
 0x9d7   :  { %v1115_v20 = vpack.c.bf16 %v1114_v18, %v1114_v18 }
 0x9d9   :  { %1486 = vmatmul.mubr.msk.bf16.vlgmr.msra.gmra.mrb[20].mxu0 %vm104_vm0, %v1115_v20 }
 0xaac   :  { %v1173_v2 = vpop.f32.mrb[20].mxu0 }
 0xaad   :  { %v1174_v23 = vadd.f32 %v1173_v2, %v1123_v21  ;;  %v1487_v24 = vpop.f32.mrb[21].mxu0 }
 0xaae   :  { %v1176_v26 = vpop.f32.mrb[22].mxu0 }
 0xaaf   :  { %v1488_v28 = vpop.f32.mrb[23].mxu0  ;;  %v1180_v32 = vsel %vm1179_vm12, %v1174_v23, 0.0  ;;  %v1185_v4 = vmul.f32 %v1174_v23, %v1174_v23 }
 0xab0   :  { %1181 = vadd.xlane.f32.xlu1 %v1180_v32 }
 0xab1   :  { %v1186_v43 = vsel %vm1179_vm12, %v1185_v4, 0.0 }
 0xab2   :  { %1187 = vadd.xlane.f32.xlu0 %v1186_v43 }
 0xb3d   :  { %v1182_v36 = vpop.xlane.xlu1 %1181 }
 0xb3e   :  { %v1184_v38 = vmul.f32 0.0625, %v1182_v36 }
 0xb3f   :  { %v1188_v39 = vpop.xlane.xlu0 %1187 }
 0xb40   :  { %v1190_v40 = vmul.f32 %v1184_v38, %v1184_v38  ;;  %v1189_v44 = vmul.f32 0.0625, %v1188_v39  ;;  %v1193_v48 = vsub.f32 %v1174_v23, %v1184_v38 }
 0xb42   :  { %v1191_v45 = vsub.f32 %v1189_v44, %v1190_v40 }
 0xb44   :  { %v1192_v29 = vmax.f32 %v1191_v45, 0.0 }
 0xb46   :  { %v1194_v46 = vadd.f32 1e-05, %v1192_v29 }
 0xb48   :  { %1581 = vrsqrt.f32 %v1194_v46 }
 0xb52   :  { %v1582_v8 = vpop.eup %1581 }
 0xb53   :  { %v1196_v50 = vmul.f32 %v1582_v8, %v1193_v48 }
 0xb55   :  { %v1201_v51 = vmul.f32 %v1200_v47, %v1196_v50 }
 0xb57   :  { %v1206_v55 = vadd.f32 %v1205_v49, %v1201_v51 }
 0xb59   :  { %v1207_v56 = vmax.f32 %v1206_v55, 0.0 }
 0xb5b   :  { %v1208_v58 = vpack.c.bf16 %v1207_v56, %v1207_v56 }
 0xb5d   :  { %1492 = vmatmul.mubr.msk.bf16.vlgmr.msra.gmra.mrb[20].mxu1 %vm199_vm2, %v1208_v58 }
 0xc30   :  { %v1258_v34 = vpop.f32.mrb[20].mxu1 }
 0xc31   :  { %v1259_v59 = vadd.f32 %v1258_v34, %v1214_v25  ;;  %v1493_v61 = vpop.f32.mrb[21].mxu1 }
 0xc32   :  { %v1261_v33 = vpop.f32.mrb[22].mxu1 }
 0xc33   :  { %v1494_v62 = vpop.f32.mrb[23].mxu1  ;;  %1265 = vst.msk [vmem:[#allocation7] sm:$0x3] %vm1264_vm13, %v1259_v59 }
 0xc34   :  { %1638 = shalt.err (!%p1635_p6)
}
 0xc35   :  { %s1639_s15 = scalar_lea.hbm %s1994_s6, 32 }
 0xc36   :  { %p1640_p7 = scmp.ne.s32.totalorder %s1994_s6, %s1639_s15  ;;  %p1643_p8 = scmp.lt.u32.totalorder %s1639_s15, %s1994_s6 }
 0xc38   :  { %p1645_p9 = pnand %p1643_p8, %p1640_p7 }
 0xc3a   :  { %1648 = shalt.err (!%p1645_p9)
}
 0xc3b   :  { %1275 = dma.vmem_to_hbm [thread:$0]  %s1273_s11, 32, %s1994_s6, [#allocation4]  }
 0xc3c   :  { %1653 = dma.done.wait [#allocation4], 32  }
 0xc3d   :  { %1654 = vsyncadd [#allocation4], 4294967264 }
 0xc3e   :  { %1279 = vsyncpa [#allocation3], 1 }
 0xc3f   :  { %1280 = vsyncpa [#allocation6], 1 }
 0xc40   :  { %1281 = vsyncpa [#allocation4], 1 }

</bundles_post_ra>
